<compile_context>
chip_gen: v6e
topology: v6e:2x2x1
jax: 0.10.0
libtpu: 0.0.40
codegen_flags: <defaults>
</compile_context>

<pallas_src>
import functools

import jax
import jax.numpy as jnp
from jax import lax
from jax.experimental import pallas as pl
from jax.experimental.pallas import tpu as pltpu


# ---------------------------------------------------------------------------
# Fused kernel: 3x3 (dilated) conv + folded BN/bias + ReLU for one row tile.
# ---------------------------------------------------------------------------
def _conv3x3_bn_act_kernel(x_ref, w_ref, scale_ref, bias_ref, out_ref,
                           xpad_ref, patch_ref, *,
                           H, W, Cin, Cout, TH, dil, act):
    t = pl.program_id(1)
    d = dil

    # Build the zero-padded image in VMEM once per batch element (row tile 0).
    @pl.when(t == 0)
    def _():
        xpad_ref[...] = jnp.zeros_like(xpad_ref)
        xpad_ref[:, d:d + H, d:d + W] = x_ref[0]

    row0 = t * TH
    if TH % 8 == 0:
        row0 = pl.multiple_of(row0, 8)

    # Row slab covering this tile plus its halo: (Cin, TH + 2d, W + 2d).
    slab = xpad_ref[:, pl.ds(row0, TH + 2 * d), :]

    # im2col (static slices only):
    #   patch[(ky*3 + kx)*Cin + c, h*W + w] = xpad[c, row0 + h + ky*d, w + kx*d]
    for ky in range(3):
        for kx in range(3):
            tap = ky * 3 + kx
            for h in range(TH):
                patch_ref[tap * Cin:(tap + 1) * Cin, h * W:(h + 1) * W] = (
                    slab[:, h + ky * d, kx * d:kx * d + W])

    # Single MXU contraction: (Cout, 9*Cin) @ (9*Cin, TH*W) -> (Cout, TH*W).
    y = jnp.dot(w_ref[...], patch_ref[...], preferred_element_type=jnp.float32)
    y = y * scale_ref[...] + bias_ref[...]          # folded BN + conv bias
    if act:
        y = jnp.maximum(y, 0.0)
    out_ref[...] = y.reshape(1, Cout, TH * W)       # lane-dense NCHW store


def _pick_tile_h(H, W):
    # Largest row tile that divides H, keeps the flattened (TH*W) store
    # lane-dense (multiple of 128) and still gives >= 2 pipeline steps.
    for th in range(min(H // 2, 64), 0, -1):
        if H % th == 0 and (th * W) % 128 == 0:
            return th
    return H  # fall back: whole image per step (block == full extent is legal)


# ---------------------------------------------------------------------------
# Wrapper: Conv2D.forward  (Conv2d 3x3 + BatchNorm2d(inference) + ReLU)
# ---------------------------------------------------------------------------
def conv2d_forward(x, weight, conv_bias, bn_gamma, bn_beta, bn_mean, bn_var,
                   *, padding=1, dilation=1, act=True, eps=1e-5, tile_h=None):
    """x: (B, Cin, H, W) f32 NCHW. weight: (Cout, Cin, 3, 3). Returns NCHW f32."""
    assert padding == dilation, "kernel implements the same-size 3x3 configuration"
    B, Cin, H, W = x.shape
    Cout = weight.shape[0]
    d = int(dilation)

    # Fold BatchNorm (inference) and the conv bias into per-channel scale/bias.
    scale = bn_gamma / jnp.sqrt(bn_var + eps)                 # (Cout,)
    bias = bn_beta - bn_mean * scale + conv_bias * scale      # (Cout,)

    # (Cout, Cin, 3, 3) -> (Cout, 9*Cin) with K ordered (ky, kx, cin).
    w_flat = jnp.transpose(weight, (0, 2, 3, 1)).reshape(Cout, 9 * Cin)

    TH = _pick_tile_h(H, W) if tile_h is None else tile_h
    assert H % TH == 0
    nT = H // TH
    S = TH * W

    kernel = functools.partial(_conv3x3_bn_act_kernel,
                               H=H, W=W, Cin=Cin, Cout=Cout, TH=TH, dil=d, act=act)

    out_flat = pl.pallas_call(
        kernel,
        out_shape=jax.ShapeDtypeStruct((B, Cout, H * W), jnp.float32),
        grid_spec=pltpu.PrefetchScalarGridSpec(
            num_scalar_prefetch=0,
            grid=(B, nT),
            in_specs=[
                pl.BlockSpec((1, Cin, H, W), lambda b, t: (b, 0, 0, 0)),   # image (revisited over t)
                pl.BlockSpec((Cout, 9 * Cin), lambda b, t: (0, 0)),        # flattened conv weight
                pl.BlockSpec((Cout, 1), lambda b, t: (0, 0)),              # folded BN scale
                pl.BlockSpec((Cout, 1), lambda b, t: (0, 0)),              # folded BN bias (+conv bias)
            ],
            out_specs=pl.BlockSpec((1, Cout, S), lambda b, t: (b, 0, t)),
            scratch_shapes=[
                pltpu.VMEM((Cin, H + 2 * d, W + 2 * d), jnp.float32),  # zero-padded image
                pltpu.VMEM((9 * Cin, S), jnp.float32),                 # im2col tile
            ],
        ),
        compiler_params=pltpu.CompilerParams(
            dimension_semantics=("parallel", "arbitrary"),
            vmem_limit_bytes=32 * 1024 * 1024,
        ),
    )(x, w_flat, scale.reshape(Cout, 1), bias.reshape(Cout, 1))

    return out_flat.reshape(B, Cout, H, W)


# ---------------------------------------------------------------------------
# Pure-JAX reference for verification
# ---------------------------------------------------------------------------
def reference_forward(x, weight, conv_bias, bn_gamma, bn_beta, bn_mean, bn_var,
                      *, padding=1, dilation=1, act=True, eps=1e-5):
    y = lax.conv_general_dilated(
        x, weight, window_strides=(1, 1),
        padding=[(padding, padding), (padding, padding)],
        rhs_dilation=(dilation, dilation),
        dimension_numbers=("NCHW", "OIHW", "NCHW"))
    y = y + conv_bias[None, :, None, None]
    scale = bn_gamma / jnp.sqrt(bn_var + eps)
    y = (y - bn_mean[None, :, None, None]) * scale[None, :, None, None] \
        + bn_beta[None, :, None, None]
    if act:
        y = jnp.maximum(y, 0.0)
    return y


if __name__ == "__main__":
    B, in_c, out_c, H, W = 2, 4, 8, 16, 16

    key = jax.random.PRNGKey(0)
    ks = jax.random.split(key, 8)
    x = jax.random.normal(ks[0], (B, in_c, H, W), jnp.float32)            # NCHW, like PyTorch
    weight = 0.1 * jax.random.normal(ks[1], (out_c, in_c, 3, 3), jnp.float32)
    conv_bias = 0.1 * jax.random.normal(ks[2], (out_c,), jnp.float32)
    gamma = 1.0 + 0.1 * jax.random.normal(ks[3], (out_c,), jnp.float32)
    beta = 0.1 * jax.random.normal(ks[4], (out_c,), jnp.float32)
    mean = 0.1 * jax.random.normal(ks[5], (out_c,), jnp.float32)
    var = jnp.abs(1.0 + 0.1 * jax.random.normal(ks[6], (out_c,), jnp.float32))

    # Default Conv2D config: kernel_size=3, padding=1, dilation=1, bias=True, act=True.
    out = jax.block_until_ready(
        conv2d_forward(x, weight, conv_bias, gamma, beta, mean, var,
                       padding=1, dilation=1, act=True))
    ref = jax.block_until_ready(
        reference_forward(x, weight, conv_bias, gamma, beta, mean, var,
                          padding=1, dilation=1, act=True))
    assert out.shape == (B, out_c, H, W)
    err = float(jnp.max(jnp.abs(out - ref)))
    assert jnp.allclose(out, ref, atol=1e-4, rtol=1e-4), err

    # Dilated configuration of the same Conv2D module (as used elsewhere in the model).
    weight3 = 0.1 * jax.random.normal(ks[7], (out_c, in_c, 3, 3), jnp.float32)
    out3 = jax.block_until_ready(
        conv2d_forward(x, weight3, conv_bias, gamma, beta, mean, var,
                       padding=3, dilation=3, act=True))
    ref3 = jax.block_until_ready(
        reference_forward(x, weight3, conv_bias, gamma, beta, mean, var,
                          padding=3, dilation=3, act=True))
    err3 = float(jnp.max(jnp.abs(out3 - ref3)))
    assert jnp.allclose(out3, ref3, atol=1e-4, rtol=1e-4), err3

    print("KERNEL_OK")
</pallas_src>

<mosaic_0001>
module attributes {stable_mosaic.version = 11 : i64} {
  func.func @_conv3x3_bn_act_kernel(%arg0: i32, %arg1: i32, %arg2: memref<1x4x16x16xf32, #tpu.memory_space<vmem>>, %arg3: memref<8x36xf32, #tpu.memory_space<vmem>>, %arg4: memref<8x1xf32, #tpu.memory_space<vmem>>, %arg5: memref<8x1xf32, #tpu.memory_space<vmem>>, %arg6: memref<1x8x128xf32, #tpu.memory_space<vmem>>, %arg7: memref<4x18x18xf32, #tpu.memory_space<vmem>>, %arg8: memref<36x128xf32, #tpu.memory_space<vmem>>) attributes {dimension_semantics = [#tpu.dimension_semantics<parallel>, #tpu.dimension_semantics<arbitrary>], iteration_bounds = array<i64: 2, 2>, scalar_prefetch = 0 : i64, scratch_operands = 2 : i64, tpu.core_type = #tpu.core_type<tc>, window_params = [{transform_indices = @transform_0, window_bounds = array<i64: 1, 4, 16, 16>}, {pipeline_mode = #tpu.pipeline_mode<synchronous>, transform_indices = @transform_1, window_bounds = array<i64: 8, 36>}, {pipeline_mode = #tpu.pipeline_mode<synchronous>, transform_indices = @transform_2, window_bounds = array<i64: 8, 1>}, {pipeline_mode = #tpu.pipeline_mode<synchronous>, transform_indices = @transform_3, window_bounds = array<i64: 8, 1>}, {transform_indices = @transform_4, window_bounds = array<i64: 1, 8, 128>}]} {
    %c0_i32 = arith.constant 0 : i32
    %0 = arith.cmpi eq, %arg1, %c0_i32 : i32
    %1 = arith.extui %0 : i1 to i32
    %c0_i32_0 = arith.constant 0 : i32
    %2 = arith.cmpi ne, %1, %c0_i32_0 : i32
    scf.if %2 {
      %cst_145 = arith.constant 0.000000e+00 : f32
      %236 = vector.broadcast %cst_145 : f32 to vector<4x18x18xf32>
      %c0_146 = arith.constant 0 : index
      %c0_147 = arith.constant 0 : index
      %c0_148 = arith.constant 0 : index
      %237 = vector.load %arg7[%c0_146, %c0_147, %c0_148] : memref<4x18x18xf32, #tpu.memory_space<vmem>>, vector<4x18x18xf32>
      tpu.vector_store %arg7[%c0_146, %c0_147, %c0_148], %236 {strides = array<i32>} : memref<4x18x18xf32, #tpu.memory_space<vmem>>, vector<4x18x18xf32>,
      %c0_149 = arith.constant 0 : index
      %c0_150 = arith.constant 0 : index
      %c0_151 = arith.constant 0 : index
      %c0_152 = arith.constant 0 : index
      %238 = vector.load %arg2[%c0_149, %c0_150, %c0_151, %c0_152] : memref<1x4x16x16xf32, #tpu.memory_space<vmem>>, vector<1x4x16x16xf32>
      %239 = vector.shape_cast %238 : vector<1x4x16x16xf32> to vector<4x16x16xf32>
      %c0_153 = arith.constant 0 : index
      %c1 = arith.constant 1 : index
      %c1_154 = arith.constant 1 : index
      %240 = vector.load %arg7[%c0_153, %c1, %c1_154] : memref<4x18x18xf32, #tpu.memory_space<vmem>>, vector<4x16x16xf32>
      tpu.vector_store %arg7[%c0_153, %c1, %c1_154], %239 {strides = array<i32>} : memref<4x18x18xf32, #tpu.memory_space<vmem>>, vector<4x16x16xf32>,
    } else {
    }
    %c8_i32 = arith.constant 8 : i32
    %3 = arith.muli %arg1, %c8_i32 : i32
    %4 = tpu.assume_multiple %3, 8 : i32
    %c0 = arith.constant 0 : index
    %5 = arith.index_cast %4 : i32 to index
    %c0_1 = arith.constant 0 : index
    %6 = vector.load %arg7[%c0, %5, %c0_1] : memref<4x18x18xf32, #tpu.memory_space<vmem>>, vector<4x10x18xf32>
    %7 = vector.extract_strided_slice %6 {offsets = [0, 0, 0], sizes = [4, 1, 16], strides = [1, 1, 1]} : vector<4x10x18xf32> to vector<4x1x16xf32>
    %8 = vector.shape_cast %7 : vector<4x1x16xf32> to vector<4x16xf32>
    %c0_2 = arith.constant 0 : index
    %c0_3 = arith.constant 0 : index
    %9 = vector.load %arg8[%c0_2, %c0_3] : memref<36x128xf32, #tpu.memory_space<vmem>>, vector<4x16xf32>
    tpu.vector_store %arg8[%c0_2, %c0_3], %8 {strides = array<i32>} : memref<36x128xf32, #tpu.memory_space<vmem>>, vector<4x16xf32>,
    %10 = vector.extract_strided_slice %6 {offsets = [0, 1, 0], sizes = [4, 1, 16], strides = [1, 1, 1]} : vector<4x10x18xf32> to vector<4x1x16xf32>
    %11 = vector.shape_cast %10 : vector<4x1x16xf32> to vector<4x16xf32>
    %c0_4 = arith.constant 0 : index
    %c16 = arith.constant 16 : index
    %12 = vector.load %arg8[%c0_4, %c16] : memref<36x128xf32, #tpu.memory_space<vmem>>, vector<4x16xf32>
    tpu.vector_store %arg8[%c0_4, %c16], %11 {strides = array<i32>} : memref<36x128xf32, #tpu.memory_space<vmem>>, vector<4x16xf32>,
    %13 = vector.extract_strided_slice %6 {offsets = [0, 2, 0], sizes = [4, 1, 16], strides = [1, 1, 1]} : vector<4x10x18xf32> to vector<4x1x16xf32>
    %14 = vector.shape_cast %13 : vector<4x1x16xf32> to vector<4x16xf32>
    %c0_5 = arith.constant 0 : index
    %c32 = arith.constant 32 : index
    %15 = vector.load %arg8[%c0_5, %c32] : memref<36x128xf32, #tpu.memory_space<vmem>>, vector<4x16xf32>
    tpu.vector_store %arg8[%c0_5, %c32], %14 {strides = array<i32>} : memref<36x128xf32, #tpu.memory_space<vmem>>, vector<4x16xf32>,
    %16 = vector.extract_strided_slice %6 {offsets = [0, 3, 0], sizes = [4, 1, 16], strides = [1, 1, 1]} : vector<4x10x18xf32> to vector<4x1x16xf32>
    %17 = vector.shape_cast %16 : vector<4x1x16xf32> to vector<4x16xf32>
    %c0_6 = arith.constant 0 : index
    %c48 = arith.constant 48 : index
    %18 = vector.load %arg8[%c0_6, %c48] : memref<36x128xf32, #tpu.memory_space<vmem>>, vector<4x16xf32>
    tpu.vector_store %arg8[%c0_6, %c48], %17 {strides = array<i32>} : memref<36x128xf32, #tpu.memory_space<vmem>>, vector<4x16xf32>,
    %19 = vector.extract_strided_slice %6 {offsets = [0, 4, 0], sizes = [4, 1, 16], strides = [1, 1, 1]} : vector<4x10x18xf32> to vector<4x1x16xf32>
    %20 = vector.shape_cast %19 : vector<4x1x16xf32> to vector<4x16xf32>
    %c0_7 = arith.constant 0 : index
    %c64 = arith.constant 64 : index
    %21 = vector.load %arg8[%c0_7, %c64] : memref<36x128xf32, #tpu.memory_space<vmem>>, vector<4x16xf32>
    tpu.vector_store %arg8[%c0_7, %c64], %20 {strides = array<i32>} : memref<36x128xf32, #tpu.memory_space<vmem>>, vector<4x16xf32>,
    %22 = vector.extract_strided_slice %6 {offsets = [0, 5, 0], sizes = [4, 1, 16], strides = [1, 1, 1]} : vector<4x10x18xf32> to vector<4x1x16xf32>
    %23 = vector.shape_cast %22 : vector<4x1x16xf32> to vector<4x16xf32>
    %c0_8 = arith.constant 0 : index
    %c80 = arith.constant 80 : index
    %24 = vector.load %arg8[%c0_8, %c80] : memref<36x128xf32, #tpu.memory_space<vmem>>, vector<4x16xf32>
    tpu.vector_store %arg8[%c0_8, %c80], %23 {strides = array<i32>} : memref<36x128xf32, #tpu.memory_space<vmem>>, vector<4x16xf32>,
    %25 = vector.extract_strided_slice %6 {offsets = [0, 6, 0], sizes = [4, 1, 16], strides = [1, 1, 1]} : vector<4x10x18xf32> to vector<4x1x16xf32>
    %26 = vector.shape_cast %25 : vector<4x1x16xf32> to vector<4x16xf32>
    %c0_9 = arith.constant 0 : index
    %c96 = arith.constant 96 : index
    %27 = vector.load %arg8[%c0_9, %c96] : memref<36x128xf32, #tpu.memory_space<vmem>>, vector<4x16xf32>
    tpu.vector_store %arg8[%c0_9, %c96], %26 {strides = array<i32>} : memref<36x128xf32, #tpu.memory_space<vmem>>, vector<4x16xf32>,
    %28 = vector.extract_strided_slice %6 {offsets = [0, 7, 0], sizes = [4, 1, 16], strides = [1, 1, 1]} : vector<4x10x18xf32> to vector<4x1x16xf32>
    %29 = vector.shape_cast %28 : vector<4x1x16xf32> to vector<4x16xf32>
    %c0_10 = arith.constant 0 : index
    %c112 = arith.constant 112 : index
    %30 = vector.load %arg8[%c0_10, %c112] : memref<36x128xf32, #tpu.memory_space<vmem>>, vector<4x16xf32>
    tpu.vector_store %arg8[%c0_10, %c112], %29 {strides = array<i32>} : memref<36x128xf32, #tpu.memory_space<vmem>>, vector<4x16xf32>,
    %31 = vector.extract_strided_slice %6 {offsets = [0, 0, 1], sizes = [4, 1, 16], strides = [1, 1, 1]} : vector<4x10x18xf32> to vector<4x1x16xf32>
    %32 = vector.shape_cast %31 : vector<4x1x16xf32> to vector<4x16xf32>
    %c4 = arith.constant 4 : index
    %c0_11 = arith.constant 0 : index
    %33 = vector.load %arg8[%c4, %c0_11] : memref<36x128xf32, #tpu.memory_space<vmem>>, vector<4x16xf32>
    tpu.vector_store %arg8[%c4, %c0_11], %32 {strides = array<i32>} : memref<36x128xf32, #tpu.memory_space<vmem>>, vector<4x16xf32>,
    %34 = vector.extract_strided_slice %6 {offsets = [0, 1, 1], sizes = [4, 1, 16], strides = [1, 1, 1]} : vector<4x10x18xf32> to vector<4x1x16xf32>
    %35 = vector.shape_cast %34 : vector<4x1x16xf32> to vector<4x16xf32>
    %c4_12 = arith.constant 4 : index
    %c16_13 = arith.constant 16 : index
    %36 = vector.load %arg8[%c4_12, %c16_13] : memref<36x128xf32, #tpu.memory_space<vmem>>, vector<4x16xf32>
    tpu.vector_store %arg8[%c4_12, %c16_13], %35 {strides = array<i32>} : memref<36x128xf32, #tpu.memory_space<vmem>>, vector<4x16xf32>,
    %37 = vector.extract_strided_slice %6 {offsets = [0, 2, 1], sizes = [4, 1, 16], strides = [1, 1, 1]} : vector<4x10x18xf32> to vector<4x1x16xf32>
    %38 = vector.shape_cast %37 : vector<4x1x16xf32> to vector<4x16xf32>
    %c4_14 = arith.constant 4 : index
    %c32_15 = arith.constant 32 : index
    %39 = vector.load %arg8[%c4_14, %c32_15] : memref<36x128xf32, #tpu.memory_space<vmem>>, vector<4x16xf32>
    tpu.vector_store %arg8[%c4_14, %c32_15], %38 {strides = array<i32>} : memref<36x128xf32, #tpu.memory_space<vmem>>, vector<4x16xf32>,
    %40 = vector.extract_strided_slice %6 {offsets = [0, 3, 1], sizes = [4, 1, 16], strides = [1, 1, 1]} : vector<4x10x18xf32> to vector<4x1x16xf32>
    %41 = vector.shape_cast %40 : vector<4x1x16xf32> to vector<4x16xf32>
    %c4_16 = arith.constant 4 : index
    %c48_17 = arith.constant 48 : index
    %42 = vector.load %arg8[%c4_16, %c48_17] : memref<36x128xf32, #tpu.memory_space<vmem>>, vector<4x16xf32>
    tpu.vector_store %arg8[%c4_16, %c48_17], %41 {strides = array<i32>} : memref<36x128xf32, #tpu.memory_space<vmem>>, vector<4x16xf32>,
    %43 = vector.extract_strided_slice %6 {offsets = [0, 4, 1], sizes = [4, 1, 16], strides = [1, 1, 1]} : vector<4x10x18xf32> to vector<4x1x16xf32>
    %44 = vector.shape_cast %43 : vector<4x1x16xf32> to vector<4x16xf32>
    %c4_18 = arith.constant 4 : index
    %c64_19 = arith.constant 64 : index
    %45 = vector.load %arg8[%c4_18, %c64_19] : memref<36x128xf32, #tpu.memory_space<vmem>>, vector<4x16xf32>
    tpu.vector_store %arg8[%c4_18, %c64_19], %44 {strides = array<i32>} : memref<36x128xf32, #tpu.memory_space<vmem>>, vector<4x16xf32>,
    %46 = vector.extract_strided_slice %6 {offsets = [0, 5, 1], sizes = [4, 1, 16], strides = [1, 1, 1]} : vector<4x10x18xf32> to vector<4x1x16xf32>
    %47 = vector.shape_cast %46 : vector<4x1x16xf32> to vector<4x16xf32>
    %c4_20 = arith.constant 4 : index
    %c80_21 = arith.constant 80 : index
    %48 = vector.load %arg8[%c4_20, %c80_21] : memref<36x128xf32, #tpu.memory_space<vmem>>, vector<4x16xf32>
    tpu.vector_store %arg8[%c4_20, %c80_21], %47 {strides = array<i32>} : memref<36x128xf32, #tpu.memory_space<vmem>>, vector<4x16xf32>,
    %49 = vector.extract_strided_slice %6 {offsets = [0, 6, 1], sizes = [4, 1, 16], strides = [1, 1, 1]} : vector<4x10x18xf32> to vector<4x1x16xf32>
    %50 = vector.shape_cast %49 : vector<4x1x16xf32> to vector<4x16xf32>
    %c4_22 = arith.constant 4 : index
    %c96_23 = arith.constant 96 : index
    %51 = vector.load %arg8[%c4_22, %c96_23] : memref<36x128xf32, #tpu.memory_space<vmem>>, vector<4x16xf32>
    tpu.vector_store %arg8[%c4_22, %c96_23], %50 {strides = array<i32>} : memref<36x128xf32, #tpu.memory_space<vmem>>, vector<4x16xf32>,
    %52 = vector.extract_strided_slice %6 {offsets = [0, 7, 1], sizes = [4, 1, 16], strides = [1, 1, 1]} : vector<4x10x18xf32> to vector<4x1x16xf32>
    %53 = vector.shape_cast %52 : vector<4x1x16xf32> to vector<4x16xf32>
    %c4_24 = arith.constant 4 : index
    %c112_25 = arith.constant 112 : index
    %54 = vector.load %arg8[%c4_24, %c112_25] : memref<36x128xf32, #tpu.memory_space<vmem>>, vector<4x16xf32>
    tpu.vector_store %arg8[%c4_24, %c112_25], %53 {strides = array<i32>} : memref<36x128xf32, #tpu.memory_space<vmem>>, vector<4x16xf32>,
    %55 = vector.extract_strided_slice %6 {offsets = [0, 0, 2], sizes = [4, 1, 16], strides = [1, 1, 1]} : vector<4x10x18xf32> to vector<4x1x16xf32>
    %56 = vector.shape_cast %55 : vector<4x1x16xf32> to vector<4x16xf32>
    %c8 = arith.constant 8 : index
    %c0_26 = arith.constant 0 : index
    %57 = vector.load %arg8[%c8, %c0_26] : memref<36x128xf32, #tpu.memory_space<vmem>>, vector<4x16xf32>
    tpu.vector_store %arg8[%c8, %c0_26], %56 {strides = array<i32>} : memref<36x128xf32, #tpu.memory_space<vmem>>, vector<4x16xf32>,
    %58 = vector.extract_strided_slice %6 {offsets = [0, 1, 2], sizes = [4, 1, 16], strides = [1, 1, 1]} : vector<4x10x18xf32> to vector<4x1x16xf32>
    %59 = vector.shape_cast %58 : vector<4x1x16xf32> to vector<4x16xf32>
    %c8_27 = arith.constant 8 : index
    %c16_28 = arith.constant 16 : index
    %60 = vector.load %arg8[%c8_27, %c16_28] : memref<36x128xf32, #tpu.memory_space<vmem>>, vector<4x16xf32>
    tpu.vector_store %arg8[%c8_27, %c16_28], %59 {strides = array<i32>} : memref<36x128xf32, #tpu.memory_space<vmem>>, vector<4x16xf32>,
    %61 = vector.extract_strided_slice %6 {offsets = [0, 2, 2], sizes = [4, 1, 16], strides = [1, 1, 1]} : vector<4x10x18xf32> to vector<4x1x16xf32>
    %62 = vector.shape_cast %61 : vector<4x1x16xf32> to vector<4x16xf32>
    %c8_29 = arith.constant 8 : index
    %c32_30 = arith.constant 32 : index
    %63 = vector.load %arg8[%c8_29, %c32_30] : memref<36x128xf32, #tpu.memory_space<vmem>>, vector<4x16xf32>
    tpu.vector_store %arg8[%c8_29, %c32_30], %62 {strides = array<i32>} : memref<36x128xf32, #tpu.memory_space<vmem>>, vector<4x16xf32>,
    %64 = vector.extract_strided_slice %6 {offsets = [0, 3, 2], sizes = [4, 1, 16], strides = [1, 1, 1]} : vector<4x10x18xf32> to vector<4x1x16xf32>
    %65 = vector.shape_cast %64 : vector<4x1x16xf32> to vector<4x16xf32>
    %c8_31 = arith.constant 8 : index
    %c48_32 = arith.constant 48 : index
    %66 = vector.load %arg8[%c8_31, %c48_32] : memref<36x128xf32, #tpu.memory_space<vmem>>, vector<4x16xf32>
    tpu.vector_store %arg8[%c8_31, %c48_32], %65 {strides = array<i32>} : memref<36x128xf32, #tpu.memory_space<vmem>>, vector<4x16xf32>,
    %67 = vector.extract_strided_slice %6 {offsets = [0, 4, 2], sizes = [4, 1, 16], strides = [1, 1, 1]} : vector<4x10x18xf32> to vector<4x1x16xf32>
    %68 = vector.shape_cast %67 : vector<4x1x16xf32> to vector<4x16xf32>
    %c8_33 = arith.constant 8 : index
    %c64_34 = arith.constant 64 : index
    %69 = vector.load %arg8[%c8_33, %c64_34] : memref<36x128xf32, #tpu.memory_space<vmem>>, vector<4x16xf32>
    tpu.vector_store %arg8[%c8_33, %c64_34], %68 {strides = array<i32>} : memref<36x128xf32, #tpu.memory_space<vmem>>, vector<4x16xf32>,
    %70 = vector.extract_strided_slice %6 {offsets = [0, 5, 2], sizes = [4, 1, 16], strides = [1, 1, 1]} : vector<4x10x18xf32> to vector<4x1x16xf32>
    %71 = vector.shape_cast %70 : vector<4x1x16xf32> to vector<4x16xf32>
    %c8_35 = arith.constant 8 : index
    %c80_36 = arith.constant 80 : index
    %72 = vector.load %arg8[%c8_35, %c80_36] : memref<36x128xf32, #tpu.memory_space<vmem>>, vector<4x16xf32>
    tpu.vector_store %arg8[%c8_35, %c80_36], %71 {strides = array<i32>} : memref<36x128xf32, #tpu.memory_space<vmem>>, vector<4x16xf32>,
    %73 = vector.extract_strided_slice %6 {offsets = [0, 6, 2], sizes = [4, 1, 16], strides = [1, 1, 1]} : vector<4x10x18xf32> to vector<4x1x16xf32>
    %74 = vector.shape_cast %73 : vector<4x1x16xf32> to vector<4x16xf32>
    %c8_37 = arith.constant 8 : index
    %c96_38 = arith.constant 96 : index
    %75 = vector.load %arg8[%c8_37, %c96_38] : memref<36x128xf32, #tpu.memory_space<vmem>>, vector<4x16xf32>
    tpu.vector_store %arg8[%c8_37, %c96_38], %74 {strides = array<i32>} : memref<36x128xf32, #tpu.memory_space<vmem>>, vector<4x16xf32>,
    %76 = vector.extract_strided_slice %6 {offsets = [0, 7, 2], sizes = [4, 1, 16], strides = [1, 1, 1]} : vector<4x10x18xf32> to vector<4x1x16xf32>
    %77 = vector.shape_cast %76 : vector<4x1x16xf32> to vector<4x16xf32>
    %c8_39 = arith.constant 8 : index
    %c112_40 = arith.constant 112 : index
    %78 = vector.load %arg8[%c8_39, %c112_40] : memref<36x128xf32, #tpu.memory_space<vmem>>, vector<4x16xf32>
    tpu.vector_store %arg8[%c8_39, %c112_40], %77 {strides = array<i32>} : memref<36x128xf32, #tpu.memory_space<vmem>>, vector<4x16xf32>,
    %79 = vector.extract_strided_slice %6 {offsets = [0, 1, 0], sizes = [4, 1, 16], strides = [1, 1, 1]} : vector<4x10x18xf32> to vector<4x1x16xf32>
    %80 = vector.shape_cast %79 : vector<4x1x16xf32> to vector<4x16xf32>
    %c12 = arith.constant 12 : index
    %c0_41 = arith.constant 0 : index
    %81 = vector.load %arg8[%c12, %c0_41] : memref<36x128xf32, #tpu.memory_space<vmem>>, vector<4x16xf32>
    tpu.vector_store %arg8[%c12, %c0_41], %80 {strides = array<i32>} : memref<36x128xf32, #tpu.memory_space<vmem>>, vector<4x16xf32>,
    %82 = vector.extract_strided_slice %6 {offsets = [0, 2, 0], sizes = [4, 1, 16], strides = [1, 1, 1]} : vector<4x10x18xf32> to vector<4x1x16xf32>
    %83 = vector.shape_cast %82 : vector<4x1x16xf32> to vector<4x16xf32>
    %c12_42 = arith.constant 12 : index
    %c16_43 = arith.constant 16 : index
    %84 = vector.load %arg8[%c12_42, %c16_43] : memref<36x128xf32, #tpu.memory_space<vmem>>, vector<4x16xf32>
    tpu.vector_store %arg8[%c12_42, %c16_43], %83 {strides = array<i32>} : memref<36x128xf32, #tpu.memory_space<vmem>>, vector<4x16xf32>,
    %85 = vector.extract_strided_slice %6 {offsets = [0, 3, 0], sizes = [4, 1, 16], strides = [1, 1, 1]} : vector<4x10x18xf32> to vector<4x1x16xf32>
    %86 = vector.shape_cast %85 : vector<4x1x16xf32> to vector<4x16xf32>
    %c12_44 = arith.constant 12 : index
    %c32_45 = arith.constant 32 : index
    %87 = vector.load %arg8[%c12_44, %c32_45] : memref<36x128xf32, #tpu.memory_space<vmem>>, vector<4x16xf32>
    tpu.vector_store %arg8[%c12_44, %c32_45], %86 {strides = array<i32>} : memref<36x128xf32, #tpu.memory_space<vmem>>, vector<4x16xf32>,
    %88 = vector.extract_strided_slice %6 {offsets = [0, 4, 0], sizes = [4, 1, 16], strides = [1, 1, 1]} : vector<4x10x18xf32> to vector<4x1x16xf32>
    %89 = vector.shape_cast %88 : vector<4x1x16xf32> to vector<4x16xf32>
    %c12_46 = arith.constant 12 : index
    %c48_47 = arith.constant 48 : index
    %90 = vector.load %arg8[%c12_46, %c48_47] : memref<36x128xf32, #tpu.memory_space<vmem>>, vector<4x16xf32>
    tpu.vector_store %arg8[%c12_46, %c48_47], %89 {strides = array<i32>} : memref<36x128xf32, #tpu.memory_space<vmem>>, vector<4x16xf32>,
    %91 = vector.extract_strided_slice %6 {offsets = [0, 5, 0], sizes = [4, 1, 16], strides = [1, 1, 1]} : vector<4x10x18xf32> to vector<4x1x16xf32>
    %92 = vector.shape_cast %91 : vector<4x1x16xf32> to vector<4x16xf32>
    %c12_48 = arith.constant 12 : index
    %c64_49 = arith.constant 64 : index
    %93 = vector.load %arg8[%c12_48, %c64_49] : memref<36x128xf32, #tpu.memory_space<vmem>>, vector<4x16xf32>
    tpu.vector_store %arg8[%c12_48, %c64_49], %92 {strides = array<i32>} : memref<36x128xf32, #tpu.memory_space<vmem>>, vector<4x16xf32>,
    %94 = vector.extract_strided_slice %6 {offsets = [0, 6, 0], sizes = [4, 1, 16], strides = [1, 1, 1]} : vector<4x10x18xf32> to vector<4x1x16xf32>
    %95 = vector.shape_cast %94 : vector<4x1x16xf32> to vector<4x16xf32>
    %c12_50 = arith.constant 12 : index
    %c80_51 = arith.constant 80 : index
    %96 = vector.load %arg8[%c12_50, %c80_51] : memref<36x128xf32, #tpu.memory_space<vmem>>, vector<4x16xf32>
    tpu.vector_store %arg8[%c12_50, %c80_51], %95 {strides = array<i32>} : memref<36x128xf32, #tpu.memory_space<vmem>>, vector<4x16xf32>,
    %97 = vector.extract_strided_slice %6 {offsets = [0, 7, 0], sizes = [4, 1, 16], strides = [1, 1, 1]} : vector<4x10x18xf32> to vector<4x1x16xf32>
    %98 = vector.shape_cast %97 : vector<4x1x16xf32> to vector<4x16xf32>
    %c12_52 = arith.constant 12 : index
    %c96_53 = arith.constant 96 : index
    %99 = vector.load %arg8[%c12_52, %c96_53] : memref<36x128xf32, #tpu.memory_space<vmem>>, vector<4x16xf32>
    tpu.vector_store %arg8[%c12_52, %c96_53], %98 {strides = array<i32>} : memref<36x128xf32, #tpu.memory_space<vmem>>, vector<4x16xf32>,
    %100 = vector.extract_strided_slice %6 {offsets = [0, 8, 0], sizes = [4, 1, 16], strides = [1, 1, 1]} : vector<4x10x18xf32> to vector<4x1x16xf32>
    %101 = vector.shape_cast %100 : vector<4x1x16xf32> to vector<4x16xf32>
    %c12_54 = arith.constant 12 : index
    %c112_55 = arith.constant 112 : index
    %102 = vector.load %arg8[%c12_54, %c112_55] : memref<36x128xf32, #tpu.memory_space<vmem>>, vector<4x16xf32>
    tpu.vector_store %arg8[%c12_54, %c112_55], %101 {strides = array<i32>} : memref<36x128xf32, #tpu.memory_space<vmem>>, vector<4x16xf32>,
    %103 = vector.extract_strided_slice %6 {offsets = [0, 1, 1], sizes = [4, 1, 16], strides = [1, 1, 1]} : vector<4x10x18xf32> to vector<4x1x16xf32>
    %104 = vector.shape_cast %103 : vector<4x1x16xf32> to vector<4x16xf32>
    %c16_56 = arith.constant 16 : index
    %c0_57 = arith.constant 0 : index
    %105 = vector.load %arg8[%c16_56, %c0_57] : memref<36x128xf32, #tpu.memory_space<vmem>>, vector<4x16xf32>
    tpu.vector_store %arg8[%c16_56, %c0_57], %104 {strides = array<i32>} : memref<36x128xf32, #tpu.memory_space<vmem>>, vector<4x16xf32>,
    %106 = vector.extract_strided_slice %6 {offsets = [0, 2, 1], sizes = [4, 1, 16], strides = [1, 1, 1]} : vector<4x10x18xf32> to vector<4x1x16xf32>
    %107 = vector.shape_cast %106 : vector<4x1x16xf32> to vector<4x16xf32>
    %c16_58 = arith.constant 16 : index
    %c16_59 = arith.constant 16 : index
    %108 = vector.load %arg8[%c16_58, %c16_59] : memref<36x128xf32, #tpu.memory_space<vmem>>, vector<4x16xf32>
    tpu.vector_store %arg8[%c16_58, %c16_59], %107 {strides = array<i32>} : memref<36x128xf32, #tpu.memory_space<vmem>>, vector<4x16xf32>,
    %109 = vector.extract_strided_slice %6 {offsets = [0, 3, 1], sizes = [4, 1, 16], strides = [1, 1, 1]} : vector<4x10x18xf32> to vector<4x1x16xf32>
    %110 = vector.shape_cast %109 : vector<4x1x16xf32> to vector<4x16xf32>
    %c16_60 = arith.constant 16 : index
    %c32_61 = arith.constant 32 : index
    %111 = vector.load %arg8[%c16_60, %c32_61] : memref<36x128xf32, #tpu.memory_space<vmem>>, vector<4x16xf32>
    tpu.vector_store %arg8[%c16_60, %c32_61], %110 {strides = array<i32>} : memref<36x128xf32, #tpu.memory_space<vmem>>, vector<4x16xf32>,
    %112 = vector.extract_strided_slice %6 {offsets = [0, 4, 1], sizes = [4, 1, 16], strides = [1, 1, 1]} : vector<4x10x18xf32> to vector<4x1x16xf32>
    %113 = vector.shape_cast %112 : vector<4x1x16xf32> to vector<4x16xf32>
    %c16_62 = arith.constant 16 : index
    %c48_63 = arith.constant 48 : index
    %114 = vector.load %arg8[%c16_62, %c48_63] : memref<36x128xf32, #tpu.memory_space<vmem>>, vector<4x16xf32>
    tpu.vector_store %arg8[%c16_62, %c48_63], %113 {strides = array<i32>} : memref<36x128xf32, #tpu.memory_space<vmem>>, vector<4x16xf32>,
    %115 = vector.extract_strided_slice %6 {offsets = [0, 5, 1], sizes = [4, 1, 16], strides = [1, 1, 1]} : vector<4x10x18xf32> to vector<4x1x16xf32>
    %116 = vector.shape_cast %115 : vector<4x1x16xf32> to vector<4x16xf32>
    %c16_64 = arith.constant 16 : index
    %c64_65 = arith.constant 64 : index
    %117 = vector.load %arg8[%c16_64, %c64_65] : memref<36x128xf32, #tpu.memory_space<vmem>>, vector<4x16xf32>
    tpu.vector_store %arg8[%c16_64, %c64_65], %116 {strides = array<i32>} : memref<36x128xf32, #tpu.memory_space<vmem>>, vector<4x16xf32>,
    %118 = vector.extract_strided_slice %6 {offsets = [0, 6, 1], sizes = [4, 1, 16], strides = [1, 1, 1]} : vector<4x10x18xf32> to vector<4x1x16xf32>
    %119 = vector.shape_cast %118 : vector<4x1x16xf32> to vector<4x16xf32>
    %c16_66 = arith.constant 16 : index
    %c80_67 = arith.constant 80 : index
    %120 = vector.load %arg8[%c16_66, %c80_67] : memref<36x128xf32, #tpu.memory_space<vmem>>, vector<4x16xf32>
    tpu.vector_store %arg8[%c16_66, %c80_67], %119 {strides = array<i32>} : memref<36x128xf32, #tpu.memory_space<vmem>>, vector<4x16xf32>,
    %121 = vector.extract_strided_slice %6 {offsets = [0, 7, 1], sizes = [4, 1, 16], strides = [1, 1, 1]} : vector<4x10x18xf32> to vector<4x1x16xf32>
    %122 = vector.shape_cast %121 : vector<4x1x16xf32> to vector<4x16xf32>
    %c16_68 = arith.constant 16 : index
    %c96_69 = arith.constant 96 : index
    %123 = vector.load %arg8[%c16_68, %c96_69] : memref<36x128xf32, #tpu.memory_space<vmem>>, vector<4x16xf32>
    tpu.vector_store %arg8[%c16_68, %c96_69], %122 {strides = array<i32>} : memref<36x128xf32, #tpu.memory_space<vmem>>, vector<4x16xf32>,
    %124 = vector.extract_strided_slice %6 {offsets = [0, 8, 1], sizes = [4, 1, 16], strides = [1, 1, 1]} : vector<4x10x18xf32> to vector<4x1x16xf32>
    %125 = vector.shape_cast %124 : vector<4x1x16xf32> to vector<4x16xf32>
    %c16_70 = arith.constant 16 : index
    %c112_71 = arith.constant 112 : index
    %126 = vector.load %arg8[%c16_70, %c112_71] : memref<36x128xf32, #tpu.memory_space<vmem>>, vector<4x16xf32>
    tpu.vector_store %arg8[%c16_70, %c112_71], %125 {strides = array<i32>} : memref<36x128xf32, #tpu.memory_space<vmem>>, vector<4x16xf32>,
    %127 = vector.extract_strided_slice %6 {offsets = [0, 1, 2], sizes = [4, 1, 16], strides = [1, 1, 1]} : vector<4x10x18xf32> to vector<4x1x16xf32>
    %128 = vector.shape_cast %127 : vector<4x1x16xf32> to vector<4x16xf32>
    %c20 = arith.constant 20 : index
    %c0_72 = arith.constant 0 : index
    %129 = vector.load %arg8[%c20, %c0_72] : memref<36x128xf32, #tpu.memory_space<vmem>>, vector<4x16xf32>
    tpu.vector_store %arg8[%c20, %c0_72], %128 {strides = array<i32>} : memref<36x128xf32, #tpu.memory_space<vmem>>, vector<4x16xf32>,
    %130 = vector.extract_strided_slice %6 {offsets = [0, 2, 2], sizes = [4, 1, 16], strides = [1, 1, 1]} : vector<4x10x18xf32> to vector<4x1x16xf32>
    %131 = vector.shape_cast %130 : vector<4x1x16xf32> to vector<4x16xf32>
    %c20_73 = arith.constant 20 : index
    %c16_74 = arith.constant 16 : index
    %132 = vector.load %arg8[%c20_73, %c16_74] : memref<36x128xf32, #tpu.memory_space<vmem>>, vector<4x16xf32>
    tpu.vector_store %arg8[%c20_73, %c16_74], %131 {strides = array<i32>} : memref<36x128xf32, #tpu.memory_space<vmem>>, vector<4x16xf32>,
    %133 = vector.extract_strided_slice %6 {offsets = [0, 3, 2], sizes = [4, 1, 16], strides = [1, 1, 1]} : vector<4x10x18xf32> to vector<4x1x16xf32>
    %134 = vector.shape_cast %133 : vector<4x1x16xf32> to vector<4x16xf32>
    %c20_75 = arith.constant 20 : index
    %c32_76 = arith.constant 32 : index
    %135 = vector.load %arg8[%c20_75, %c32_76] : memref<36x128xf32, #tpu.memory_space<vmem>>, vector<4x16xf32>
    tpu.vector_store %arg8[%c20_75, %c32_76], %134 {strides = array<i32>} : memref<36x128xf32, #tpu.memory_space<vmem>>, vector<4x16xf32>,
    %136 = vector.extract_strided_slice %6 {offsets = [0, 4, 2], sizes = [4, 1, 16], strides = [1, 1, 1]} : vector<4x10x18xf32> to vector<4x1x16xf32>
    %137 = vector.shape_cast %136 : vector<4x1x16xf32> to vector<4x16xf32>
    %c20_77 = arith.constant 20 : index
    %c48_78 = arith.constant 48 : index
    %138 = vector.load %arg8[%c20_77, %c48_78] : memref<36x128xf32, #tpu.memory_space<vmem>>, vector<4x16xf32>
    tpu.vector_store %arg8[%c20_77, %c48_78], %137 {strides = array<i32>} : memref<36x128xf32, #tpu.memory_space<vmem>>, vector<4x16xf32>,
    %139 = vector.extract_strided_slice %6 {offsets = [0, 5, 2], sizes = [4, 1, 16], strides = [1, 1, 1]} : vector<4x10x18xf32> to vector<4x1x16xf32>
    %140 = vector.shape_cast %139 : vector<4x1x16xf32> to vector<4x16xf32>
    %c20_79 = arith.constant 20 : index
    %c64_80 = arith.constant 64 : index
    %141 = vector.load %arg8[%c20_79, %c64_80] : memref<36x128xf32, #tpu.memory_space<vmem>>, vector<4x16xf32>
    tpu.vector_store %arg8[%c20_79, %c64_80], %140 {strides = array<i32>} : memref<36x128xf32, #tpu.memory_space<vmem>>, vector<4x16xf32>,
    %142 = vector.extract_strided_slice %6 {offsets = [0, 6, 2], sizes = [4, 1, 16], strides = [1, 1, 1]} : vector<4x10x18xf32> to vector<4x1x16xf32>
    %143 = vector.shape_cast %142 : vector<4x1x16xf32> to vector<4x16xf32>
    %c20_81 = arith.constant 20 : index
    %c80_82 = arith.constant 80 : index
    %144 = vector.load %arg8[%c20_81, %c80_82] : memref<36x128xf32, #tpu.memory_space<vmem>>, vector<4x16xf32>
    tpu.vector_store %arg8[%c20_81, %c80_82], %143 {strides = array<i32>} : memref<36x128xf32, #tpu.memory_space<vmem>>, vector<4x16xf32>,
    %145 = vector.extract_strided_slice %6 {offsets = [0, 7, 2], sizes = [4, 1, 16], strides = [1, 1, 1]} : vector<4x10x18xf32> to vector<4x1x16xf32>
    %146 = vector.shape_cast %145 : vector<4x1x16xf32> to vector<4x16xf32>
    %c20_83 = arith.constant 20 : index
    %c96_84 = arith.constant 96 : index
    %147 = vector.load %arg8[%c20_83, %c96_84] : memref<36x128xf32, #tpu.memory_space<vmem>>, vector<4x16xf32>
    tpu.vector_store %arg8[%c20_83, %c96_84], %146 {strides = array<i32>} : memref<36x128xf32, #tpu.memory_space<vmem>>, vector<4x16xf32>,
    %148 = vector.extract_strided_slice %6 {offsets = [0, 8, 2], sizes = [4, 1, 16], strides = [1, 1, 1]} : vector<4x10x18xf32> to vector<4x1x16xf32>
    %149 = vector.shape_cast %148 : vector<4x1x16xf32> to vector<4x16xf32>
    %c20_85 = arith.constant 20 : index
    %c112_86 = arith.constant 112 : index
    %150 = vector.load %arg8[%c20_85, %c112_86] : memref<36x128xf32, #tpu.memory_space<vmem>>, vector<4x16xf32>
    tpu.vector_store %arg8[%c20_85, %c112_86], %149 {strides = array<i32>} : memref<36x128xf32, #tpu.memory_space<vmem>>, vector<4x16xf32>,
    %151 = vector.extract_strided_slice %6 {offsets = [0, 2, 0], sizes = [4, 1, 16], strides = [1, 1, 1]} : vector<4x10x18xf32> to vector<4x1x16xf32>
    %152 = vector.shape_cast %151 : vector<4x1x16xf32> to vector<4x16xf32>
    %c24 = arith.constant 24 : index
    %c0_87 = arith.constant 0 : index
    %153 = vector.load %arg8[%c24, %c0_87] : memref<36x128xf32, #tpu.memory_space<vmem>>, vector<4x16xf32>
    tpu.vector_store %arg8[%c24, %c0_87], %152 {strides = array<i32>} : memref<36x128xf32, #tpu.memory_space<vmem>>, vector<4x16xf32>,
    %154 = vector.extract_strided_slice %6 {offsets = [0, 3, 0], sizes = [4, 1, 16], strides = [1, 1, 1]} : vector<4x10x18xf32> to vector<4x1x16xf32>
    %155 = vector.shape_cast %154 : vector<4x1x16xf32> to vector<4x16xf32>
    %c24_88 = arith.constant 24 : index
    %c16_89 = arith.constant 16 : index
    %156 = vector.load %arg8[%c24_88, %c16_89] : memref<36x128xf32, #tpu.memory_space<vmem>>, vector<4x16xf32>
    tpu.vector_store %arg8[%c24_88, %c16_89], %155 {strides = array<i32>} : memref<36x128xf32, #tpu.memory_space<vmem>>, vector<4x16xf32>,
    %157 = vector.extract_strided_slice %6 {offsets = [0, 4, 0], sizes = [4, 1, 16], strides = [1, 1, 1]} : vector<4x10x18xf32> to vector<4x1x16xf32>
    %158 = vector.shape_cast %157 : vector<4x1x16xf32> to vector<4x16xf32>
    %c24_90 = arith.constant 24 : index
    %c32_91 = arith.constant 32 : index
    %159 = vector.load %arg8[%c24_90, %c32_91] : memref<36x128xf32, #tpu.memory_space<vmem>>, vector<4x16xf32>
    tpu.vector_store %arg8[%c24_90, %c32_91], %158 {strides = array<i32>} : memref<36x128xf32, #tpu.memory_space<vmem>>, vector<4x16xf32>,
    %160 = vector.extract_strided_slice %6 {offsets = [0, 5, 0], sizes = [4, 1, 16], strides = [1, 1, 1]} : vector<4x10x18xf32> to vector<4x1x16xf32>
    %161 = vector.shape_cast %160 : vector<4x1x16xf32> to vector<4x16xf32>
    %c24_92 = arith.constant 24 : index
    %c48_93 = arith.constant 48 : index
    %162 = vector.load %arg8[%c24_92, %c48_93] : memref<36x128xf32, #tpu.memory_space<vmem>>, vector<4x16xf32>
    tpu.vector_store %arg8[%c24_92, %c48_93], %161 {strides = array<i32>} : memref<36x128xf32, #tpu.memory_space<vmem>>, vector<4x16xf32>,
    %163 = vector.extract_strided_slice %6 {offsets = [0, 6, 0], sizes = [4, 1, 16], strides = [1, 1, 1]} : vector<4x10x18xf32> to vector<4x1x16xf32>
    %164 = vector.shape_cast %163 : vector<4x1x16xf32> to vector<4x16xf32>
    %c24_94 = arith.constant 24 : index
    %c64_95 = arith.constant 64 : index
    %165 = vector.load %arg8[%c24_94, %c64_95] : memref<36x128xf32, #tpu.memory_space<vmem>>, vector<4x16xf32>
    tpu.vector_store %arg8[%c24_94, %c64_95], %164 {strides = array<i32>} : memref<36x128xf32, #tpu.memory_space<vmem>>, vector<4x16xf32>,
    %166 = vector.extract_strided_slice %6 {offsets = [0, 7, 0], sizes = [4, 1, 16], strides = [1, 1, 1]} : vector<4x10x18xf32> to vector<4x1x16xf32>
    %167 = vector.shape_cast %166 : vector<4x1x16xf32> to vector<4x16xf32>
    %c24_96 = arith.constant 24 : index
    %c80_97 = arith.constant 80 : index
    %168 = vector.load %arg8[%c24_96, %c80_97] : memref<36x128xf32, #tpu.memory_space<vmem>>, vector<4x16xf32>
    tpu.vector_store %arg8[%c24_96, %c80_97], %167 {strides = array<i32>} : memref<36x128xf32, #tpu.memory_space<vmem>>, vector<4x16xf32>,
    %169 = vector.extract_strided_slice %6 {offsets = [0, 8, 0], sizes = [4, 1, 16], strides = [1, 1, 1]} : vector<4x10x18xf32> to vector<4x1x16xf32>
    %170 = vector.shape_cast %169 : vector<4x1x16xf32> to vector<4x16xf32>
    %c24_98 = arith.constant 24 : index
    %c96_99 = arith.constant 96 : index
    %171 = vector.load %arg8[%c24_98, %c96_99] : memref<36x128xf32, #tpu.memory_space<vmem>>, vector<4x16xf32>
    tpu.vector_store %arg8[%c24_98, %c96_99], %170 {strides = array<i32>} : memref<36x128xf32, #tpu.memory_space<vmem>>, vector<4x16xf32>,
    %172 = vector.extract_strided_slice %6 {offsets = [0, 9, 0], sizes = [4, 1, 16], strides = [1, 1, 1]} : vector<4x10x18xf32> to vector<4x1x16xf32>
    %173 = vector.shape_cast %172 : vector<4x1x16xf32> to vector<4x16xf32>
    %c24_100 = arith.constant 24 : index
    %c112_101 = arith.constant 112 : index
    %174 = vector.load %arg8[%c24_100, %c112_101] : memref<36x128xf32, #tpu.memory_space<vmem>>, vector<4x16xf32>
    tpu.vector_store %arg8[%c24_100, %c112_101], %173 {strides = array<i32>} : memref<36x128xf32, #tpu.memory_space<vmem>>, vector<4x16xf32>,
    %175 = vector.extract_strided_slice %6 {offsets = [0, 2, 1], sizes = [4, 1, 16], strides = [1, 1, 1]} : vector<4x10x18xf32> to vector<4x1x16xf32>
    %176 = vector.shape_cast %175 : vector<4x1x16xf32> to vector<4x16xf32>
    %c28 = arith.constant 28 : index
    %c0_102 = arith.constant 0 : index
    %177 = vector.load %arg8[%c28, %c0_102] : memref<36x128xf32, #tpu.memory_space<vmem>>, vector<4x16xf32>
    tpu.vector_store %arg8[%c28, %c0_102], %176 {strides = array<i32>} : memref<36x128xf32, #tpu.memory_space<vmem>>, vector<4x16xf32>,
    %178 = vector.extract_strided_slice %6 {offsets = [0, 3, 1], sizes = [4, 1, 16], strides = [1, 1, 1]} : vector<4x10x18xf32> to vector<4x1x16xf32>
    %179 = vector.shape_cast %178 : vector<4x1x16xf32> to vector<4x16xf32>
    %c28_103 = arith.constant 28 : index
    %c16_104 = arith.constant 16 : index
    %180 = vector.load %arg8[%c28_103, %c16_104] : memref<36x128xf32, #tpu.memory_space<vmem>>, vector<4x16xf32>
    tpu.vector_store %arg8[%c28_103, %c16_104], %179 {strides = array<i32>} : memref<36x128xf32, #tpu.memory_space<vmem>>, vector<4x16xf32>,
    %181 = vector.extract_strided_slice %6 {offsets = [0, 4, 1], sizes = [4, 1, 16], strides = [1, 1, 1]} : vector<4x10x18xf32> to vector<4x1x16xf32>
    %182 = vector.shape_cast %181 : vector<4x1x16xf32> to vector<4x16xf32>
    %c28_105 = arith.constant 28 : index
    %c32_106 = arith.constant 32 : index
    %183 = vector.load %arg8[%c28_105, %c32_106] : memref<36x128xf32, #tpu.memory_space<vmem>>, vector<4x16xf32>
    tpu.vector_store %arg8[%c28_105, %c32_106], %182 {strides = array<i32>} : memref<36x128xf32, #tpu.memory_space<vmem>>, vector<4x16xf32>,
    %184 = vector.extract_strided_slice %6 {offsets = [0, 5, 1], sizes = [4, 1, 16], strides = [1, 1, 1]} : vector<4x10x18xf32> to vector<4x1x16xf32>
    %185 = vector.shape_cast %184 : vector<4x1x16xf32> to vector<4x16xf32>
    %c28_107 = arith.constant 28 : index
    %c48_108 = arith.constant 48 : index
    %186 = vector.load %arg8[%c28_107, %c48_108] : memref<36x128xf32, #tpu.memory_space<vmem>>, vector<4x16xf32>
    tpu.vector_store %arg8[%c28_107, %c48_108], %185 {strides = array<i32>} : memref<36x128xf32, #tpu.memory_space<vmem>>, vector<4x16xf32>,
    %187 = vector.extract_strided_slice %6 {offsets = [0, 6, 1], sizes = [4, 1, 16], strides = [1, 1, 1]} : vector<4x10x18xf32> to vector<4x1x16xf32>
    %188 = vector.shape_cast %187 : vector<4x1x16xf32> to vector<4x16xf32>
    %c28_109 = arith.constant 28 : index
    %c64_110 = arith.constant 64 : index
    %189 = vector.load %arg8[%c28_109, %c64_110] : memref<36x128xf32, #tpu.memory_space<vmem>>, vector<4x16xf32>
    tpu.vector_store %arg8[%c28_109, %c64_110], %188 {strides = array<i32>} : memref<36x128xf32, #tpu.memory_space<vmem>>, vector<4x16xf32>,
    %190 = vector.extract_strided_slice %6 {offsets = [0, 7, 1], sizes = [4, 1, 16], strides = [1, 1, 1]} : vector<4x10x18xf32> to vector<4x1x16xf32>
    %191 = vector.shape_cast %190 : vector<4x1x16xf32> to vector<4x16xf32>
    %c28_111 = arith.constant 28 : index
    %c80_112 = arith.constant 80 : index
    %192 = vector.load %arg8[%c28_111, %c80_112] : memref<36x128xf32, #tpu.memory_space<vmem>>, vector<4x16xf32>
    tpu.vector_store %arg8[%c28_111, %c80_112], %191 {strides = array<i32>} : memref<36x128xf32, #tpu.memory_space<vmem>>, vector<4x16xf32>,
    %193 = vector.extract_strided_slice %6 {offsets = [0, 8, 1], sizes = [4, 1, 16], strides = [1, 1, 1]} : vector<4x10x18xf32> to vector<4x1x16xf32>
    %194 = vector.shape_cast %193 : vector<4x1x16xf32> to vector<4x16xf32>
    %c28_113 = arith.constant 28 : index
    %c96_114 = arith.constant 96 : index
    %195 = vector.load %arg8[%c28_113, %c96_114] : memref<36x128xf32, #tpu.memory_space<vmem>>, vector<4x16xf32>
    tpu.vector_store %arg8[%c28_113, %c96_114], %194 {strides = array<i32>} : memref<36x128xf32, #tpu.memory_space<vmem>>, vector<4x16xf32>,
    %196 = vector.extract_strided_slice %6 {offsets = [0, 9, 1], sizes = [4, 1, 16], strides = [1, 1, 1]} : vector<4x10x18xf32> to vector<4x1x16xf32>
    %197 = vector.shape_cast %196 : vector<4x1x16xf32> to vector<4x16xf32>
    %c28_115 = arith.constant 28 : index
    %c112_116 = arith.constant 112 : index
    %198 = vector.load %arg8[%c28_115, %c112_116] : memref<36x128xf32, #tpu.memory_space<vmem>>, vector<4x16xf32>
    tpu.vector_store %arg8[%c28_115, %c112_116], %197 {strides = array<i32>} : memref<36x128xf32, #tpu.memory_space<vmem>>, vector<4x16xf32>,
    %199 = vector.extract_strided_slice %6 {offsets = [0, 2, 2], sizes = [4, 1, 16], strides = [1, 1, 1]} : vector<4x10x18xf32> to vector<4x1x16xf32>
    %200 = vector.shape_cast %199 : vector<4x1x16xf32> to vector<4x16xf32>
    %c32_117 = arith.constant 32 : index
    %c0_118 = arith.constant 0 : index
    %201 = vector.load %arg8[%c32_117, %c0_118] : memref<36x128xf32, #tpu.memory_space<vmem>>, vector<4x16xf32>
    tpu.vector_store %arg8[%c32_117, %c0_118], %200 {strides = array<i32>} : memref<36x128xf32, #tpu.memory_space<vmem>>, vector<4x16xf32>,
    %202 = vector.extract_strided_slice %6 {offsets = [0, 3, 2], sizes = [4, 1, 16], strides = [1, 1, 1]} : vector<4x10x18xf32> to vector<4x1x16xf32>
    %203 = vector.shape_cast %202 : vector<4x1x16xf32> to vector<4x16xf32>
    %c32_119 = arith.constant 32 : index
    %c16_120 = arith.constant 16 : index
    %204 = vector.load %arg8[%c32_119, %c16_120] : memref<36x128xf32, #tpu.memory_space<vmem>>, vector<4x16xf32>
    tpu.vector_store %arg8[%c32_119, %c16_120], %203 {strides = array<i32>} : memref<36x128xf32, #tpu.memory_space<vmem>>, vector<4x16xf32>,
    %205 = vector.extract_strided_slice %6 {offsets = [0, 4, 2], sizes = [4, 1, 16], strides = [1, 1, 1]} : vector<4x10x18xf32> to vector<4x1x16xf32>
    %206 = vector.shape_cast %205 : vector<4x1x16xf32> to vector<4x16xf32>
    %c32_121 = arith.constant 32 : index
    %c32_122 = arith.constant 32 : index
    %207 = vector.load %arg8[%c32_121, %c32_122] : memref<36x128xf32, #tpu.memory_space<vmem>>, vector<4x16xf32>
    tpu.vector_store %arg8[%c32_121, %c32_122], %206 {strides = array<i32>} : memref<36x128xf32, #tpu.memory_space<vmem>>, vector<4x16xf32>,
    %208 = vector.extract_strided_slice %6 {offsets = [0, 5, 2], sizes = [4, 1, 16], strides = [1, 1, 1]} : vector<4x10x18xf32> to vector<4x1x16xf32>
    %209 = vector.shape_cast %208 : vector<4x1x16xf32> to vector<4x16xf32>
    %c32_123 = arith.constant 32 : index
    %c48_124 = arith.constant 48 : index
    %210 = vector.load %arg8[%c32_123, %c48_124] : memref<36x128xf32, #tpu.memory_space<vmem>>, vector<4x16xf32>
    tpu.vector_store %arg8[%c32_123, %c48_124], %209 {strides = array<i32>} : memref<36x128xf32, #tpu.memory_space<vmem>>, vector<4x16xf32>,
    %211 = vector.extract_strided_slice %6 {offsets = [0, 6, 2], sizes = [4, 1, 16], strides = [1, 1, 1]} : vector<4x10x18xf32> to vector<4x1x16xf32>
    %212 = vector.shape_cast %211 : vector<4x1x16xf32> to vector<4x16xf32>
    %c32_125 = arith.constant 32 : index
    %c64_126 = arith.constant 64 : index
    %213 = vector.load %arg8[%c32_125, %c64_126] : memref<36x128xf32, #tpu.memory_space<vmem>>, vector<4x16xf32>
    tpu.vector_store %arg8[%c32_125, %c64_126], %212 {strides = array<i32>} : memref<36x128xf32, #tpu.memory_space<vmem>>, vector<4x16xf32>,
    %214 = vector.extract_strided_slice %6 {offsets = [0, 7, 2], sizes = [4, 1, 16], strides = [1, 1, 1]} : vector<4x10x18xf32> to vector<4x1x16xf32>
    %215 = vector.shape_cast %214 : vector<4x1x16xf32> to vector<4x16xf32>
    %c32_127 = arith.constant 32 : index
    %c80_128 = arith.constant 80 : index
    %216 = vector.load %arg8[%c32_127, %c80_128] : memref<36x128xf32, #tpu.memory_space<vmem>>, vector<4x16xf32>
    tpu.vector_store %arg8[%c32_127, %c80_128], %215 {strides = array<i32>} : memref<36x128xf32, #tpu.memory_space<vmem>>, vector<4x16xf32>,
    %217 = vector.extract_strided_slice %6 {offsets = [0, 8, 2], sizes = [4, 1, 16], strides = [1, 1, 1]} : vector<4x10x18xf32> to vector<4x1x16xf32>
    %218 = vector.shape_cast %217 : vector<4x1x16xf32> to vector<4x16xf32>
    %c32_129 = arith.constant 32 : index
    %c96_130 = arith.constant 96 : index
    %219 = vector.load %arg8[%c32_129, %c96_130] : memref<36x128xf32, #tpu.memory_space<vmem>>, vector<4x16xf32>
    tpu.vector_store %arg8[%c32_129, %c96_130], %218 {strides = array<i32>} : memref<36x128xf32, #tpu.memory_space<vmem>>, vector<4x16xf32>,
    %220 = vector.extract_strided_slice %6 {offsets = [0, 9, 2], sizes = [4, 1, 16], strides = [1, 1, 1]} : vector<4x10x18xf32> to vector<4x1x16xf32>
    %221 = vector.shape_cast %220 : vector<4x1x16xf32> to vector<4x16xf32>
    %c32_131 = arith.constant 32 : index
    %c112_132 = arith.constant 112 : index
    %222 = vector.load %arg8[%c32_131, %c112_132] : memref<36x128xf32, #tpu.memory_space<vmem>>, vector<4x16xf32>
    tpu.vector_store %arg8[%c32_131, %c112_132], %221 {strides = array<i32>} : memref<36x128xf32, #tpu.memory_space<vmem>>, vector<4x16xf32>,
    %c0_133 = arith.constant 0 : index
    %c0_134 = arith.constant 0 : index
    %223 = vector.load %arg3[%c0_133, %c0_134] : memref<8x36xf32, #tpu.memory_space<vmem>>, vector<8x36xf32>
    %c0_135 = arith.constant 0 : index
    %c0_136 = arith.constant 0 : index
    %224 = vector.load %arg8[%c0_135, %c0_136] : memref<36x128xf32, #tpu.memory_space<vmem>>, vector<36x128xf32>
    %cst = arith.constant dense<0.000000e+00> : vector<8x128xf32>
    %225 = tpu.matmul %223, %224, %cst {dimension_numbers = #tpu.dot_dimension_numbers<[1], [0], [0], [1], [0, 0, 1, 1], [], []>} : vector<8x36xf32>, vector<36x128xf32>, vector<8x128xf32> -> vector<8x128xf32>
    %c0_137 = arith.constant 0 : index
    %c0_138 = arith.constant 0 : index
    %226 = vector.load %arg4[%c0_137, %c0_138] : memref<8x1xf32, #tpu.memory_space<vmem>>, vector<8x1xf32>
    %227 = vector.broadcast %226 : vector<8x1xf32> to vector<8x128xf32>
    %228 = arith.mulf %225, %227 : vector<8x128xf32>
    %c0_139 = arith.constant 0 : index
    %c0_140 = arith.constant 0 : index
    %229 = vector.load %arg5[%c0_139, %c0_140] : memref<8x1xf32, #tpu.memory_space<vmem>>, vector<8x1xf32>
    %230 = vector.broadcast %229 : vector<8x1xf32> to vector<8x128xf32>
    %231 = arith.addf %228, %230 : vector<8x128xf32>
    %cst_141 = arith.constant 0.000000e+00 : f32
    %232 = vector.broadcast %cst_141 : f32 to vector<8x128xf32>
    %233 = arith.maximumf %231, %232 : vector<8x128xf32>
    %234 = vector.shape_cast %233 : vector<8x128xf32> to vector<1x8x128xf32>
    %c0_142 = arith.constant 0 : index
    %c0_143 = arith.constant 0 : index
    %c0_144 = arith.constant 0 : index
    %235 = vector.load %arg6[%c0_142, %c0_143, %c0_144] : memref<1x8x128xf32, #tpu.memory_space<vmem>>, vector<1x8x128xf32>
    tpu.vector_store %arg6[%c0_142, %c0_143, %c0_144], %234 {strides = array<i32>} : memref<1x8x128xf32, #tpu.memory_space<vmem>>, vector<1x8x128xf32>,
    return
  }
  func.func @transform_0(%arg0: i32, %arg1: i32) -> (i32, i32, i32, i32) {
    %c0_i32 = arith.constant 0 : i32
    %c0_i32_0 = arith.constant 0 : i32
    %c0_i32_1 = arith.constant 0 : i32
    %c0_i32_2 = arith.constant 0 : i32
    return %arg0, %c0_i32, %c0_i32_0, %c0_i32_1 : i32, i32, i32, i32
  }
  func.func @transform_1(%arg0: i32, %arg1: i32) -> (i32, i32) {
    %c0_i32 = arith.constant 0 : i32
    %c0_i32_0 = arith.constant 0 : i32
    %c0_i32_1 = arith.constant 0 : i32
    return %c0_i32, %c0_i32_0 : i32, i32
  }
  func.func @transform_2(%arg0: i32, %arg1: i32) -> (i32, i32) {
    %c0_i32 = arith.constant 0 : i32
    %c0_i32_0 = arith.constant 0 : i32
    %c0_i32_1 = arith.constant 0 : i32
    return %c0_i32, %c0_i32_0 : i32, i32
  }
  func.func @transform_3(%arg0: i32, %arg1: i32) -> (i32, i32) {
    %c0_i32 = arith.constant 0 : i32
    %c0_i32_0 = arith.constant 0 : i32
    %c0_i32_1 = arith.constant 0 : i32
    return %c0_i32, %c0_i32_0 : i32, i32
  }
  func.func @transform_4(%arg0: i32, %arg1: i32) -> (i32, i32, i32) {
    %c0_i32 = arith.constant 0 : i32
    %c0_i32_0 = arith.constant 0 : i32
    return %arg0, %c0_i32, %arg1 : i32, i32, i32
  }
}

</mosaic_0001>

<bundles_post_ra>
// kernel: tpu_custom_call.1
= control target key start
LH: loop header
LB: loop body
LE: loop exit
PB: predicated region body
PF: predicated region fallthrough
CT: control target
= control target key end

     0   :  { %9 = vsyncpa [#allocation5], 0  ;;  %s1972_s0 = inlined_call_operand.hbm [shape: f32[2,4,16,16], index: 0, kind: input, shape index: {}]   ;;  %s1973_s1 = inlined_call_operand.vmem [shape: f32[8,36], index: 1, kind: input, shape index: {}]   ;;  %s1974_s2 = inlined_call_operand.vmem [shape: f32[8,1], index: 2, kind: input, shape index: {}]   ;;  %s1975_s3 = inlined_call_operand.vmem [shape: f32[8,1], index: 3, kind: input, shape index: {}]   ;;  %s1976_s4 = inlined_call_operand.hbm [shape: f32[2,8,256], index: 4, kind: output, shape index: {}]  }
   0x1   :  { %11 = vsyncpa [#allocation5 + $0x1], 0 }
   0x2   :  { %12 = vsyncpa [#allocation6], 0 }
   0x3   :  { %14 = vsyncpa [#allocation6 + $0x1], 0  ;;  %s1359_s15 = smov 0   ;;  %s1361_s16 = smov 0  }
   0x4   :  { %s1363_s17 = smov 0   ;;  %s1365_s18 = smov 0  }
   0x5   :  { %s1367_s19 = smov 0   ;;  %s1369_s20 = smov 0  }
   0x6   :  { %s1371_s21 = smov 0   ;;  %s1373_s22 = smov 0  }
   0x7   :  { %s1375_s23 = smov 0   ;;  %s1377_s24 = smov 0  }
   0x8   :  { %s1379_s25 = smov 0  }
   0x9 LB: > { %1992 = sst [smem:[#allocation10_spill]] %s1292_s23  ;;  %s979_s26 = sadd.s32 4294967295, %s1300_s25   ;;  %s1300_s25 = sphi %s1379_s25, %s20_s25   ;;  %s1296_s24 = sphi %s1377_s24, %s2013_s24   ;;  %s1292_s23 = sphi %s1375_s23, %s2012_s23   ;;  %s1288_s22 = sphi %s1373_s22, %s2011_s22   ;;  %s1284_s21 = sphi %s1371_s21, %s2010_s21   ;;  %s1280_s20 = sphi %s1369_s20, %s2019_s20   ;;  %s1276_s19 = sphi %s1367_s19, %s2018_s19   ;;  %s1272_s18 = sphi %s1365_s18, %s2017_s18   ;;  %s1268_s17 = sphi %s1363_s17, %s2016_s17   ;;  %s1264_s16 = sphi %s1361_s16, %s2015_s16   ;;  %s1260_s15 = sphi %s1359_s15, %s2014_s15  }
   0xa   : > { %1993 = sst [smem:[#allocation11_spill]] %s1296_s24  ;;  %s980_s27 = sadd.s32 4294967294, %s1300_s25  }
   0xb   : > { %s29_s28 = sadd.s32 1, %s1292_s23  ;;  %s32_s29 = sadd.s32 1, %s1296_s24 }
   0xc   : > { %p30_p0 = scmp.ge.s32.totalorder %s29_s28, 2  ;;  %s39_s30 = sadd.s32 1, %s1280_s20 }
   0xd   : > { %p46_p1 = scmp.ne.s32.totalorder %s1280_s20, %s1276_s19  ;;  %p47_p2 = scmp.eq.s32.totalorder %s1300_s25, 0 }
   0xe   : > { %s2021_s28 = smov (%p30_p0, %s29_s28), 0  ;;  %s2023_s29 = smov (!%p30_p0, %s32_s29), %s1296_s24 }
   0xf   : > { %1994 = sst [smem:[#allocation12_spill]] %s2021_s28  ;;  %p1423_p3 = por %p47_p2, %p46_p1 }
  0x10   : > { %p52_p4 = scmp.ne.s32.totalorder %s1276_s19, %s1272_s18  ;;  %p34_p5 = scmp.ge.s32.totalorder %s2023_s29, 2 }
  0x11   : > { %p53_p6 = scmp.eq.s32.totalorder %s979_s26, 0  ;;  %s126_s6 = ssub.s32 %s1292_s23, %s2021_s28 }
  0x12   : > { %s130_s7 = sadd.s32 1, %s1268_s17  ;;  %s2025_s29 = smov (%p34_p5, %s2023_s29), 0 }
  0x13   : > { %1996 = sst [smem:[#allocation13_spill]] %s2025_s29  ;;  %p1433_p7 = por %p53_p6, %p52_p4 }
  0x14   : > { %p140_p8 = scmp.ne.s32.totalorder %s1268_s17, %s1264_s16  ;;  %s36_s9 = ssub.s32 %s1296_s24, %s2025_s29 }
  0x15   : > { %p141_p9 = scmp.eq.s32.totalorder %s979_s26, 3  ;;  %p37_p10 = scmp.eq.s32.totalorder %s36_s9, 0 }
  0x16   : > { %s127_s10 = sor.u32 %s126_s6, %s36_s9  ;;  %p146_p13 = scmp.ne.s32.totalorder %s1264_s16, %s1260_s15 }
  0x17   : > { %p128_p11 = scmp.eq.s32.totalorder %s127_s10, 0  ;;  %p1441_p12 = por %p141_p9, %p140_p8 }
  0x18   : > { %s1446_s12 = scalar_select %p37_p10, %s1280_s20, %s39_s30  }
  0x19   : > { %s1449_s13 = scalar_select %p128_p11, %s1268_s17, %s130_s7  }
  0x1a   : > { %p147_p0 = scmp.eq.s32.totalorder %s980_s27, 3  ;;  %p1030_p1 = scmp.lt.s32.totalorder %s1300_s25, 4 }
  0x1b   : > { %s176_s18 = sand.u32 1, %s1280_s20   ;;  %s998_s6 = sshll.u32 %s1296_s24, 10 }
  0x1c   : > { %p1454_p2 = por %p147_p0, %p146_p13  ;;  %s983_s26 = sshll.u32 %s176_s18, 6 }
  0x1d   : > { %s186_s29 = scalar_lea.hbm %s1972_s0, %s998_s6  ;;  %s180_s28 = scalar_lea.vmem [#allocation4], %s983_s26 }
  0x1e   : > { %s187_s23 = sshll.u32 %s180_s28, 4  ;;  %p1465_p4 = pnand %p1030_p1, %p1423_p3  ;;  %s188_s23 = int_to_ptr.vmem [resolvable:$true] %s187_s23 }
  0x1f   : > { %p986_p5 = scmp.ge.s32.totalorder %s1300_s25, 1  ;;  %s177_s27 = scalar_lea.sflag [#allocation5], %s176_s18 }
  0x20   : > { %p1154_p6 = pneg %p1465_p4  ;;  %s1165_s7 = scalar_lea.vmem %s188_s23, 1024 }
  0x21   : > { %p1166_p8 = scmp.ne.s32.totalorder %s188_s23, %s1165_s7  ;;  %s1302_s24 = smov [#allocation4]  }
  0x22   : > { %s1170_s9 = sshll.u32 %s1302_s24, 4  ;;  %s1171_s9 = int_to_ptr.vmem [resolvable:$false] %s1170_s9 }
  0x23   : > { %p1168_p9 = pnand %p1166_p8, %p1154_p6  ;;  %s1172_s26 = scalar_lea.vmem %s1171_s9, 2048 }
  0x24   : > { %p1173_p11 = scmp.lt.s32.totalorder %s188_s23, %s1171_s9  ;;  %p1174_p13 = scmp.lt.s32.totalorder %s1172_s26, %s1165_s7 }
  0x25   : > { %p1169_p10 = pneg %p1168_p9 }
  0x26   : > { %p1175_p0 = por %p1174_p13, %p1173_p11 }
  0x28   : > { %p1176_p3 = pnand %p1175_p0, %p1169_p10 }
  0x2a   : > { %1179 = shalt.err (!%p1176_p3)
}
  0x2b   : > { %s1303_s28 = smov 128   ;;  %s1304_s5 = smov 8  }
  0x2c   : > { %1025 = dma.hbm_to_vmem [thread:$0]  (!%p1465_p4), %s186_s29, 1024, %s188_s23, %s177_s27, %s1303_s28, %s1303_s28, %s1304_s5  }
  0x2d   : > { %p195_p1 = scmp.lt.s32.totalorder %s1300_s25, 5 }
  0x2f   : > { %p196_p6 = pnand %p986_p5, %p195_p1 }
  0x30   : > { %s201_s24 = sand.u32 (!%p196_p6), 1, %s1276_s19  }
  0x31   : > { %199 = sbr.rel (%p196_p6) target bundleno = 728 (0x2d8), region = 36  ;;  %s987_s18 = sshll.u32 (!%p196_p6), %s201_s24, 6 }
  0x32   : > { %s202_s6 = scalar_lea.sflag (!%p196_p6), [#allocation5], %s201_s24  ;;  %s1478_s10 = scalar_lea.vmem (!%p196_p6), [#allocation4], %s987_s18 }
  0x36   : > { %1251 = dma.done.wait (%p1433_p7), %s202_s6, 1024  }
  0x37   : > { %1253 = vsyncadd (%p1433_p7), %s202_s6, 4294966272  ;;  %s1981_s30 = sand.u32 1, %s1264_s16   ;;  %p989_p4 = scmp.ne.s32.totalorder %s1284_s21, 0 }
  0x38   : > { %s1487_s23 = sshll.u32 %s1981_s30, 3  ;;  %s1305_s8 = smov (!%p989_p4), 1  }
  0x39   : > { %233 = sbr.rel (%p989_p4) target bundleno = 191 (0xbf), region = 44 }
  0x3e   : > { %v250_v0 = vld [vmem:[%s1478_s10 + $0x10] sm:$0xff]  ;;  %v248_v1 = vld [vmem:[%s1478_s10] sm:$0xff]  ;;  %vm234_vm0 = vcmask 146432   ;;  %vm237_vm1 = vcmask 140288   ;;  %v251_v2 = vld [vmem:[%s1478_s10 + $0x18] sm:$0xff]  ;;  %v1306_v4 = vmov 0.0  }
  0x3f   : > { %268 = vrot.lane.b32.xlu1 %v250_v0, %s1305_s8  ;;  %264 = vrot.lane.b32.xlu0 %v248_v1, %s1305_s8  ;;  %v249_v3 = vld [vmem:[%s1478_s10 + $0x8] sm:$0xff]  ;;  %239 = vst.msk [vmem:[#allocation2 + $0x18] sm:$0xff] %vm234_vm0, %v1306_v4  ;;  %240 = vst.msk [vmem:[#allocation2 + $0x20] sm:$0xff] %vm234_vm0, %v1306_v4  ;;  %v252_v6 = vld [vmem:[%s1478_s10 + $0x20] sm:$0xff]  ;;  %vm288_vm2 = vcmask 138248  }
  0x40   : > { %235 = vst.msk [vmem:[#allocation2] sm:$0xff] %vm234_vm0, %v1306_v4  ;;  %236 = vst.msk [vmem:[#allocation2 + $0x8] sm:$0xff] %vm234_vm0, %v1306_v4  ;;  %v253_v5 = vld [vmem:[%s1478_s10 + $0x28] sm:$0xff]  ;;  %v255_v7 = vld [vmem:[%s1478_s10 + $0x38] sm:$0xff] }
  0x41   : > { %242 = vst.msk [vmem:[#allocation2 + $0x30] sm:$0xff] %vm234_vm0, %v1306_v4  ;;  %243 = vst.msk [vmem:[#allocation2 + $0x38] sm:$0xff] %vm234_vm0, %v1306_v4  ;;  %v254_v8 = vld [vmem:[%s1478_s10 + $0x30] sm:$0xff] }
  0x42   : > { %245 = vst.msk [vmem:[#allocation2 + $0x48] sm:$0xff] %vm234_vm0, %v1306_v4  ;;  %246 = vst.msk [vmem:[#allocation2 + $0x50] sm:$0xff] %vm234_vm0, %v1306_v4 }
  0x43   : > { %241 = vst.msk [vmem:[#allocation2 + $0x28] sm:$0x3] %vm237_vm1, %v1306_v4  ;;  %238 = vst.msk [vmem:[#allocation2 + $0x10] sm:$0x3] %vm237_vm1, %v1306_v4  ;;  %270 = vrot.lane.b32.xlu1 %v251_v2, %s1305_s8  ;;  %266 = vrot.lane.b32.xlu0 %v249_v3, %s1305_s8 }
  0x44   : > { %244 = vst.msk [vmem:[#allocation2 + $0x40] sm:$0x3] %vm237_vm1, %v1306_v4  ;;  %247 = vst.msk [vmem:[#allocation2 + $0x58] sm:$0x3] %vm237_vm1, %v1306_v4 }
  0x47   : > { %274 = vrot.lane.b32.xlu1 %v253_v5, %s1305_s8  ;;  %272 = vrot.lane.b32.xlu0 %v252_v6, %s1305_s8 }
  0x4b   : > { %278 = vrot.lane.b32.xlu1 %v255_v7, %s1305_s8  ;;  %276 = vrot.lane.b32.xlu0 %v254_v8, %s1305_s8 }
  0xb1   : > { %v269_v9 = vpop.permute.xlu1 %268  ;;  %v265_v10 = vpop.permute.xlu0 %264 }
  0xb2   : > { %291 = vst.msk [vmem:[#allocation2 + $0x19] sm:$0xff] %vm288_vm2, %v269_v9  ;;  %289 = vst.msk [vmem:[#allocation2 + $0x1] sm:$0xff] %vm288_vm2, %v265_v10 }
  0xb5   : > { %v271_v11 = vpop.permute.xlu1 %270  ;;  %v267_v12 = vpop.permute.xlu0 %266 }
  0xb6   : > { %292 = vst.msk [vmem:[#allocation2 + $0x21] sm:$0xff] %vm288_vm2, %v271_v11  ;;  %290 = vst.msk [vmem:[#allocation2 + $0x9] sm:$0xff] %vm288_vm2, %v267_v12 }
  0xb9   : > { %v275_v13 = vpop.permute.xlu1 %274  ;;  %v273_v14 = vpop.permute.xlu0 %272 }
  0xba   : > { %294 = vst.msk [vmem:[#allocation2 + $0x39] sm:$0xff] %vm288_vm2, %v275_v13  ;;  %293 = vst.msk [vmem:[#allocation2 + $0x31] sm:$0xff] %vm288_vm2, %v273_v14 }
  0xbd   : > { %v279_v15 = vpop.permute.xlu1 %278  ;;  %v277_v16 = vpop.permute.xlu0 %276 }
  0xbe   : > { %296 = vst.msk [vmem:[#allocation2 + $0x51] sm:$0xff] %vm288_vm2, %v279_v15  ;;  %295 = vst.msk [vmem:[#allocation2 + $0x49] sm:$0xff] %vm288_vm2, %v277_v16 }
  0xbf PF: > { %s990_s27 = sshll.u32 %s1284_s21, 3  ;;  %vm318_vm3 = vcmask 1043459   ;;  %vm325_vm4 = vcmask 1044484   ;;  %vm343_vm5 = vcmask 1046534   ;;  %vm334_vm6 = vcmask 1045509   ;;  %s1307_s9 = smov 127  }
  0xc0   : > { %s1508_s7 = scalar_lea.vmem [#allocation2], %s990_s27  ;;  %vm315_vm7 = vcmask 1042434   ;;  %vm352_vm8 = vcmask 1047559   ;;  %vm635_vm9 = vcmask 128002   ;;  %s1308_s26 = smov 126   ;;  %vm484_vm10 = vcmask 126977  }
  0xc1   : > { %s1309_s28 = smov 30   ;;  %s1310_s5 = smov 14   ;;  %vm312_vm11 = vcmask 1041409   ;;  %vm321_vm12 = vcmask 125952   ;;  %v1324_v58 = vmov 0.0   ;;  %vm640_vm13 = vcmask 260227  }
  0xc2   : > { %s1984_s24 = smov 15   ;;  %s1312_s18 = smov 16   ;;  %1005 = vmatprep.subr.mxu0 %v1324_v58  ;;  %vm645_vm14 = vcmask 392452   ;;  %vm655_vm15 = vcmask 516480   ;;  %vm653_vm0 = vcmask 523653   ;;  %vm665_vm1 = vcmask 648704  }
  0xc3   : > { %s1313_s6 = smov 46   ;;  %s1314_s10 = smov 31   ;;  %vm663_vm2 = vcmask 654854  }
  0xc4   : > { %s1315_s8 = smov 32   ;;  %s1316_s27 = smov 62  }
  0xc5   : > { %v1511_v17 = vld [vmem:[%s1508_s7] sm:$0xff]  ;;  %v301_v18 = vld [vmem:[%s1508_s7 + $0x18] sm:$0xff]  ;;  %v303_v19 = vld [vmem:[%s1508_s7 + $0x30] sm:$0xff]  ;;  %s1318_s30 = smov 47   ;;  %s1319_s29 = smov 78  }
  0xc6   : > { %v305_v20 = vld [vmem:[%s1508_s7 + $0x48] sm:$0xff]  ;;  %v1516_v21 = vrot.slane %v301_v18, 7  ;;  %v1518_v22 = vrot.slane %v303_v19, 6  ;;  %v1536_v30 = vld [vmem:[%s1508_s7 + $0x20] sm:$0x3] }
  0xc7   : > { %v1520_v23 = vrot.slane %v305_v20, 5  ;;  %v1545_v33 = vld [vmem:[%s1508_s7 + $0x38] sm:$0x3]  ;;  %v1552_v34 = vld [vmem:[%s1508_s7 + $0x50] sm:$0x3]  ;;  %v535_v38 = vrot.slane %v1536_v30, 7 }
  0xc8   : > { %v332_v24 = vsel %vm318_vm3, %v1516_v21, %v1511_v17  ;;  %v350_v25 = vsel %vm334_vm6, %v1516_v21, %v1511_v17  ;;  %v341_v26 = vsel %vm325_vm4, %v1516_v21, %v1511_v17  ;;  %v323_v32 = vsel %vm315_vm7, %v1516_v21, %v1511_v17  ;;  %v300_v39 = vld [vmem:[%s1508_s7 + $0x8] sm:$0x3]  ;;  %s1982_s7 = smov 48  }
  0xc9   : > { %v333_v27 = vsel %vm325_vm4, %v1518_v22, %v332_v24  ;;  %v351_v28 = vsel %vm343_vm5, %v1518_v22, %v350_v25  ;;  %v342_v29 = vsel %vm334_vm6, %v1518_v22, %v341_v26  ;;  %v324_v37 = vsel %vm318_vm3, %v1518_v22, %v323_v32 }
  0xca   : > { %v1539_v31 = vsel %vm334_vm6, %v1520_v23, %v333_v27  ;;  %v1558_v35 = vsel %vm352_vm8, %v1520_v23, %v351_v28  ;;  %v1562_v36 = vsel %vm343_vm5, %v1520_v23, %v342_v29  ;;  %v537_v40 = vrot.slane %v1545_v33, 6 }
  0xcb   : > { %690 = vrot.lane.b32.xlu1 %v1539_v31, %s1307_s9  ;;  %734 = vrot.lane.b32.xlu0 %v1539_v31, %s1308_s26  ;;  %636 = vst.msk [vmem:[#allocation3 + $0x16] sm:$0x3c] %vm635_vm9, %v1539_v31  ;;  %v539_v41 = vrot.slane %v1552_v34, 5  ;;  %v682_v42 = vsel %vm315_vm7, %v535_v38, %v300_v39  ;;  %v1577_v43 = vsel %vm325_vm4, %v1520_v23, %v324_v37  ;;  %vm494_vm6 = vcmask 391427  }
  0xcc   : > { %v683_v44 = vsel %vm318_vm3, %v537_v40, %v682_v42  ;;  %485 = vst.msk [vmem:[#allocation3 + $0xb] sm:$0x1e] %vm484_vm10, %v1577_v43  ;;  %v359_v46 = vsel %vm343_vm5, %v1516_v21, %v1511_v17  ;;  %v1611_v48 = vsel %vm312_vm11, %v1520_v23, %v1518_v22  ;;  %v1616_v49 = vsel %vm352_vm8, %v1516_v21, %v1511_v17 }
  0xcd   : > { %v1581_v45 = vsel %vm325_vm4, %v539_v41, %v683_v44  ;;  %v1594_v47 = vsel %vm352_vm8, %v1518_v22, %v359_v46  ;;  %v313_v50 = vsel %vm312_vm11, %v1516_v21, %v1511_v17  ;;  %v383_v53 = vsel %vm312_vm11, %v1518_v22, %v1516_v21 }
  0xce   : > { %v316_v51 = vsel %vm315_vm7, %v1518_v22, %v313_v50  ;;  %v1647_v54 = vsel %vm315_vm7, %v1520_v23, %v383_v53  ;;  %v536_v55 = vsel %vm312_vm11, %v535_v38, %v300_v39  ;;  %vm675_vm4 = vcmask 780928  }
  0xcf   : > { %742 = vrot.lane.b32.xlu1 %v1558_v35, %s1309_s28  ;;  %738 = vrot.lane.b32.xlu0 %v1562_v36, %s1310_s5  ;;  %v319_v52 = vsel %vm318_vm3, %v1520_v23, %v316_v51  ;;  %v538_v56 = vsel %vm315_vm7, %v537_v40, %v536_v55  ;;  %vm673_vm5 = vcmask 786055   ;;  %vm680_vm7 = vcmask 913152  }
  0xd0   : > { %322 = vst.msk [vmem:[#allocation3] sm:$0xf] %vm321_vm12, %v319_v52  ;;  %v1667_v57 = vsel %vm318_vm3, %v539_v41, %v538_v56  ;;  %vm489_vm3 = vcmask 259202   ;;  %vm330_vm8 = vcmask 258177   ;;  %v1332_v32 = vmov 0  }
  0xd1   : > { %1150 = vset.pattern.permute.xlu0 %v1332_v32  ;;  %1151 = vset.pattern.permute.xlu1 %v1332_v32  ;;  %vm688_vm11 = vcmask 1045377  }
  0xd3   : > { %694 = vrot.lane.b32.xlu1 %v1562_v36, %s1984_s24  ;;  %637 = vrot.lane.b32.xlu0 %v1562_v36, %s1312_s18 }
  0xd7   : > { %748 = vrot.lane.b32.xlu1 %v1520_v23, %s1313_s6  ;;  %746 = vrot.lane.b32.xlu0 %v1594_v47, %s1313_s6 }
  0xdb   : > { %590 = vrot.lane.b32.xlu1 %v1577_v43, %s1308_s26  ;;  %546 = vrot.lane.b32.xlu0 %v1577_v43, %s1307_s9 }
  0xdf   : > { %698 = vrot.lane.b32.xlu1 %v1558_v35, %s1314_s10  ;;  %642 = vrot.lane.b32.xlu0 %v1558_v35, %s1315_s8 }
  0xe3   : > { %756 = vrot.lane.b32.xlu1 %v1611_v48, %s1316_s27  ;;  %754 = vrot.lane.b32.xlu0 %v1616_v49, %s1316_s27 }
  0xe7   : > { %594 = vrot.lane.b32.xlu1 %v1539_v31, %s1310_s5  ;;  %550 = vrot.lane.b32.xlu0 %v1539_v31, %s1984_s24  ;;  %s1991_s24 = smov 63  }
  0xeb   : > { %649 = vrot.lane.b32.xlu1 %v1520_v23, %s1982_s7  ;;  %647 = vrot.lane.b32.xlu0 %v1594_v47, %s1982_s7  ;;  %s1985_s7 = smov 64  }
  0xef   : > { %704 = vrot.lane.b32.xlu1 %v1520_v23, %s1318_s30  ;;  %702 = vrot.lane.b32.xlu0 %v1594_v47, %s1318_s30 }
  0xf3   : > { %764 = vrot.lane.b32.xlu1 %v1647_v54, %s1319_s29  ;;  %762 = vrot.lane.b32.xlu0 %v1511_v17, %s1319_s29 }
  0xf7   : > { %554 = vrot.lane.b32.xlu1 %v1562_v36, %s1314_s10  ;;  %439 = vrot.lane.b32.xlu0 %v319_v52, %s1308_s26  ;;  %s1987_s26 = smov 94  }
  0xfb   : > { %657 = vrot.lane.b32.xlu1 %v1616_v49, %s1985_s7  ;;  %598 = vrot.lane.b32.xlu0 %v1562_v36, %s1309_s28 }
  0xff   : > { %710 = vrot.lane.b32.xlu1 %v1616_v49, %s1991_s24  ;;  %659 = vrot.lane.b32.xlu0 %v1611_v48, %s1985_s7  ;;  %s1323_s7 = smov 80  }
 0x103   : > { %770 = vrot.lane.b32.xlu1 %v1667_v57, %s1987_s26  ;;  %712 = vrot.lane.b32.xlu0 %v1611_v48, %s1991_s24  ;;  %s1325_s26 = smov 79  }
 0x107   : > { %486 = vrot.lane.b32.xlu1 %v1539_v31, %s1312_s18  ;;  %443 = vrot.lane.b32.xlu0 %v1577_v43, %s1310_s5  ;;  %s1989_s5 = smov 110  }
 0x10b   : > { %602 = vrot.lane.b32.xlu1 %v1558_v35, %s1313_s6  ;;  %558 = vrot.lane.b32.xlu0 %v1558_v35, %s1318_s30 }
 0x10f   : > { %669 = vrot.lane.b32.xlu1 %v1647_v54, %s1323_s7  ;;  %667 = vrot.lane.b32.xlu0 %v1511_v17, %s1323_s7 }
 0x113   : > { %720 = vrot.lane.b32.xlu1 %v1647_v54, %s1325_s26  ;;  %718 = vrot.lane.b32.xlu0 %v1511_v17, %s1325_s26 }
 0x117   : > { %395 = vrot.lane.b32.xlu1 %v319_v52, %s1307_s9  ;;  %774 = vrot.lane.b32.xlu0 %v1581_v45, %s1989_s5  ;;  %s1327_s9 = smov 95   ;;  %s1328_s5 = smov 96  }
 0x11b   : > { %491 = vrot.lane.b32.xlu1 %v1562_v36, %s1315_s8  ;;  %447 = vrot.lane.b32.xlu0 %v1539_v31, %s1309_s28  ;;  %s2001_s28 = smov 15  }
 0x11f   : > { %564 = vrot.lane.b32.xlu1 %v1520_v23, %s1991_s24  ;;  %562 = vrot.lane.b32.xlu0 %v1594_v47, %s1991_s24  ;;  %s2002_s24 = smov 48  }
 0x123   : > { %608 = vrot.lane.b32.xlu1 %v1520_v23, %s1316_s27  ;;  %606 = vrot.lane.b32.xlu0 %v1594_v47, %s1316_s27 }
 0x127   : > { %726 = vrot.lane.b32.xlu1 %v1667_v57, %s1327_s9  ;;  %677 = vrot.lane.b32.xlu0 %v1667_v57, %s1328_s5 }
 0x12b   : > { %399 = vrot.lane.b32.xlu1 %v1577_v43, %s2001_s28  ;;  %327 = vrot.lane.b32.xlu0 %v1577_v43, %s1312_s18  ;;  %s1329_s28 = smov 111   ;;  %s1330_s18 = smov 112  }
 0x12f   : > { %496 = vrot.lane.b32.xlu1 %v1558_v35, %s2002_s24  ;;  %451 = vrot.lane.b32.xlu0 %v1562_v36, %s1313_s6  ;;  %s2003_s6 = smov 64  }
 0x133   : > { %572 = vrot.lane.b32.xlu1 %v1611_v48, %s1325_s26  ;;  %570 = vrot.lane.b32.xlu0 %v1616_v49, %s1325_s26 }
 0x137   : > { %616 = vrot.lane.b32.xlu1 %v1611_v48, %s1319_s29  ;;  %614 = vrot.lane.b32.xlu0 %v1616_v49, %s1319_s29 }
 0x13b   : > { %730 = vrot.lane.b32.xlu1 %v1581_v45, %s1329_s28  ;;  %685 = vrot.lane.b32.xlu0 %v1581_v45, %s1330_s18 }
 0x13d   : > { %v691_v59 = vpop.permute.xlu1 %690  ;;  %v735_v60 = vpop.permute.xlu0 %734 }
 0x13e   : > { %693 = vst.msk [vmem:[#allocation3 + $0x1a] sm:$0x3c] %vm635_vm9, %v691_v59  ;;  %737 = vst.msk [vmem:[#allocation3 + $0x1e] sm:$0x3c] %vm635_vm9, %v735_v60  ;;  %vm499_vm9 = vcmask 523652  }
 0x13f   : > { %403 = vrot.lane.b32.xlu1 %v1539_v31, %s1314_s10  ;;  %336 = vrot.lane.b32.xlu0 %v1539_v31, %s1315_s8  ;;  %s2004_s10 = smov 94  }
 0x141   : > { %v743_v61 = vpop.permute.xlu1 %742  ;;  %v739_v62 = vpop.permute.xlu0 %738 }
 0x142   : > { %741 = vst.msk [vmem:[#allocation3 + $0x1d] sm:$0x78] %vm640_vm13, %v739_v62 }
 0x143   : > { %501 = vrot.lane.b32.xlu1 %v1594_v47, %s2003_s6  ;;  %455 = vrot.lane.b32.xlu0 %v1558_v35, %s1316_s27  ;;  %745 = vst.msk [vmem:[#allocation3 + $0x1c] sm:$0xf0] %vm645_vm14, %v743_v61 }
 0x145   : > { %v695_v63 = vpop.permute.xlu1 %694  ;;  %v638_v0 = vpop.permute.xlu0 %637 }
 0x146   : > { %697 = vst.msk [vmem:[#allocation3 + $0x19] sm:$0x78] %vm640_vm13, %v695_v63  ;;  %641 = vst.msk [vmem:[#allocation3 + $0x15] sm:$0x78] %vm640_vm13, %v638_v0  ;;  %vm339_vm13 = vcmask 390402  }
 0x147   : > { %578 = vrot.lane.b32.xlu1 %v1511_v17, %s1327_s9  ;;  %503 = vrot.lane.b32.xlu0 %v1520_v23, %s2003_s6 }
 0x149   : > { %v749_v1 = vpop.permute.xlu1 %748  ;;  %v747_v2 = vpop.permute.xlu0 %746 }
 0x14a   : > { %753 = vst.msk [vmem:[#allocation3 + $0x23] sm:$0x1] %vm655_vm15, %v749_v1 }
 0x14b   : > { %752 = vst.msk [vmem:[#allocation3 + $0x1b] sm:$0xe0] %vm653_vm0, %v747_v2  ;;  %622 = vrot.lane.b32.xlu1 %v1511_v17, %s2004_s10  ;;  %580 = vrot.lane.b32.xlu0 %v1647_v54, %s1327_s9 }
 0x14d   : > { %v591_v3 = vpop.permute.xlu1 %590  ;;  %v547_v4 = vpop.permute.xlu0 %546 }
 0x14e   : > { %593 = vst.msk [vmem:[#allocation3 + $0x13] sm:$0x1e] %vm484_vm10, %v591_v3  ;;  %549 = vst.msk [vmem:[#allocation3 + $0xf] sm:$0x1e] %vm484_vm10, %v547_v4  ;;  %vm1331_vm10 = vmmov 0  }
 0x14f   : > { %345 = vrot.lane.b32.xlu1 %v1562_v36, %s2002_s24  ;;  %624 = vrot.lane.b32.xlu0 %v1647_v54, %s2004_s10 }
 0x150   : > { %1015 = vmatprep.mubr.msk.f32.mxu0 %vm1331_vm10, %v1324_v58  ;;  %vm381_vm10 = vcmask 911104  }
 0x151   : > { %v699_v5 = vpop.permute.xlu1 %698  ;;  %v643_v6 = vpop.permute.xlu0 %642 }
 0x152   : > { %701 = vst.msk [vmem:[#allocation3 + $0x18] sm:$0xf0] %vm645_vm14, %v699_v5  ;;  %646 = vst.msk [vmem:[#allocation3 + $0x14] sm:$0xf0] %vm645_vm14, %v643_v6  ;;  %vm509_vm14 = vcmask 647680  }
 0x153   : > { %459 = vrot.lane.b32.xlu1 %v1594_v47, %s1319_s29  ;;  %407 = vrot.lane.b32.xlu0 %v1562_v36, %s1318_s30  ;;  %s2005_s30 = smov 110   ;;  %v869_v36 = vld [vmem:[%s1975_s3] sm:$0xff] }
 0x155   : > { %v757_v7 = vpop.permute.xlu1 %756  ;;  %v755_v8 = vpop.permute.xlu0 %754 }
 0x156   : > { %761 = vst.msk [vmem:[#allocation3 + $0x22] sm:$0x3] %vm665_vm1, %v757_v7 }
 0x157   : > { %760 = vst.msk [vmem:[#allocation3 + $0x1a] sm:$0xc0] %vm663_vm2, %v755_v8  ;;  %511 = vrot.lane.b32.xlu1 %v1616_v49, %s1323_s7  ;;  %461 = vrot.lane.b32.xlu0 %v1520_v23, %s1319_s29  ;;  %s2006_s29 = smov 63  }
 0x159   : > { %v595_v9 = vpop.permute.xlu1 %594  ;;  %v551_v10 = vpop.permute.xlu0 %550 }
 0x15a   : > { %597 = vst.msk [vmem:[#allocation3 + $0x12] sm:$0x3c] %vm489_vm3, %v595_v9  ;;  %553 = vst.msk [vmem:[#allocation3 + $0xe] sm:$0x3c] %vm489_vm3, %v551_v10 }
 0x15b   : > { %586 = vrot.lane.b32.xlu1 %v1667_v57, %s1329_s28  ;;  %513 = vrot.lane.b32.xlu0 %v1611_v48, %s1323_s7 }
 0x15d   : > { %v650_v11 = vpop.permute.xlu1 %649  ;;  %v648_v12 = vpop.permute.xlu0 %647 }
 0x15e   : > { %656 = vst.msk [vmem:[#allocation3 + $0x1b] sm:$0x1] %vm655_vm15, %v650_v11 }
 0x15f   : > { %654 = vst.msk [vmem:[#allocation3 + $0x13] sm:$0xe0] %vm653_vm0, %v648_v12  ;;  %354 = vrot.lane.b32.xlu1 %v1558_v35, %s2003_s6  ;;  %630 = vrot.lane.b32.xlu0 %v1667_v57, %s2005_s30  ;;  %s2007_s6 = scalar_lea.vmem [#allocation7], %s1487_s23 }
 0x160   : > { %s2008_s8 = smov %s2007_s6 }
 0x161   : > { %v705_v13 = vpop.permute.xlu1 %704  ;;  %v703_v14 = vpop.permute.xlu0 %702 }
 0x162   : > { %709 = vst.msk [vmem:[#allocation3 + $0x1f] sm:$0x1] %vm655_vm15, %v705_v13  ;;  %vm507_vm15 = vcmask 654853  }
 0x163   : > { %708 = vst.msk [vmem:[#allocation3 + $0x17] sm:$0xe0] %vm653_vm0, %v703_v14  ;;  %467 = vrot.lane.b32.xlu1 %v1616_v49, %s2004_s10  ;;  %411 = vrot.lane.b32.xlu0 %v1558_v35, %s2006_s29  ;;  %v862_v35 = vld [vmem:[%s1974_s2] sm:$0xff]  ;;  %vm788_vm0 = vcmask 1043456  }
 0x165   : > { %v765_v15 = vpop.permute.xlu1 %764  ;;  %v763_v16 = vpop.permute.xlu0 %762 }
 0x166   : > { %769 = vst.msk [vmem:[#allocation3 + $0x21] sm:$0x7] %vm675_vm4, %v765_v15 }
 0x167   : > { %768 = vst.msk [vmem:[#allocation3 + $0x19] sm:$0x80] %vm673_vm5, %v763_v16  ;;  %521 = vrot.lane.b32.xlu1 %v1511_v17, %s1328_s5  ;;  %469 = vrot.lane.b32.xlu0 %v1611_v48, %s2004_s10  ;;  %s894_s10 = sshll.u32 %s2007_s6, 4  ;;  %s895_s10 = int_to_ptr.vmem [resolvable:$true] %s894_s10 }
 0x169   : > { %v555_v18 = vpop.permute.xlu1 %554  ;;  %v440_v19 = vpop.permute.xlu0 %439 }
 0x16a   : > { %557 = vst.msk [vmem:[#allocation3 + $0xd] sm:$0x78] %vm494_vm6, %v555_v18 }
 0x16b   : > { %442 = vst.msk [vmem:[#allocation3 + $0x8] sm:$0xf] %vm321_vm12, %v440_v19  ;;  %361 = vrot.lane.b32.xlu1 %v1594_v47, %s1323_s7  ;;  %523 = vrot.lane.b32.xlu0 %v1647_v54, %s1328_s5 }
 0x16d   : > { %v658_v20 = vpop.permute.xlu1 %657  ;;  %v599_v21 = vpop.permute.xlu0 %598 }
 0x16e   : > { %664 = vst.msk [vmem:[#allocation3 + $0x12] sm:$0xc0] %vm663_vm2, %v658_v20 }
 0x16f   : > { %601 = vst.msk [vmem:[#allocation3 + $0x11] sm:$0x78] %vm494_vm6, %v599_v21  ;;  %415 = vrot.lane.b32.xlu1 %v1594_v47, %s1325_s26  ;;  %363 = vrot.lane.b32.xlu0 %v1520_v23, %s1323_s7  ;;  %s1180_s7 = scalar_lea.vmem %s895_s10, 128 }
 0x170   : > { %p1181_p7 = scmp.ne.s32.totalorder %s895_s10, %s1180_s7 }
 0x171   : > { %v711_v22 = vpop.permute.xlu1 %710  ;;  %v660_v24 = vpop.permute.xlu0 %659 }
 0x172   : > { %716 = vst.msk [vmem:[#allocation3 + $0x16] sm:$0xc0] %vm663_vm2, %v711_v22  ;;  %vm517_vm2 = vcmask 786054   ;;  %p1182_p5 = pnand %p1181_p7, %p1441_p12 }
 0x173   : > { %666 = vst.msk [vmem:[#allocation3 + $0x1a] sm:$0x3] %vm665_vm1, %v660_v24  ;;  %475 = vrot.lane.b32.xlu1 %v1511_v17, %s2005_s30  ;;  %417 = vrot.lane.b32.xlu0 %v1520_v23, %s1325_s26 }
 0x174   : > { %p1183_p8 = pneg %p1182_p5 }
 0x175   : > { %v771_v25 = vpop.permute.xlu1 %770  ;;  %v713_v26 = vpop.permute.xlu0 %712 }
 0x176   : > { %773 = vst.msk [vmem:[#allocation3 + $0x20] sm:$0xf] %vm680_vm7, %v771_v25 }
 0x177   : > { %717 = vst.msk [vmem:[#allocation3 + $0x1e] sm:$0x3] %vm665_vm1, %v713_v26  ;;  %541 = vrot.lane.b32.xlu1 %v1667_v57, %s1330_s18  ;;  %477 = vrot.lane.b32.xlu0 %v1647_v54, %s2005_s30  ;;  %vm519_vm1 = vcmask 779904  }
 0x179   : > { %v487_v27 = vpop.permute.xlu1 %486  ;;  %v444_v28 = vpop.permute.xlu0 %443 }
 0x17a   : > { %490 = vst.msk [vmem:[#allocation3 + $0xa] sm:$0x3c] %vm489_vm3, %v487_v27  ;;  %vm357_vm3 = vcmask 654852  }
 0x17b   : > { %446 = vst.msk [vmem:[#allocation3 + $0x7] sm:$0x1e] %vm330_vm8, %v444_v28  ;;  %375 = vrot.lane.b32.xlu1 %v1611_v48, %s1328_s5  ;;  %373 = vrot.lane.b32.xlu0 %v1616_v49, %s1328_s5 }
 0x17d   : > { %v603_v23 = vpop.permute.xlu1 %602  ;;  %v559_v29 = vpop.permute.xlu0 %558 }
 0x17e   : > { %605 = vst.msk [vmem:[#allocation3 + $0x10] sm:$0xf0] %vm499_vm9, %v603_v23  ;;  %561 = vst.msk [vmem:[#allocation3 + $0xc] sm:$0xf0] %vm499_vm9, %v559_v29 }
 0x17f   : > { %425 = vrot.lane.b32.xlu1 %v1611_v48, %s1327_s9  ;;  %423 = vrot.lane.b32.xlu0 %v1616_v49, %s1327_s9  ;;  %s994_s9 = sshll.u32 %s1288_s22, 1  ;;  %s2009_s22 = sand.u32 1, %s1264_s16  }
 0x180   : > { %s879_s27 = scalar_lea.sflag [#allocation6], %s2009_s22 }
 0x181   : > { %v670_v30 = vpop.permute.xlu1 %669  ;;  %v668_v31 = vpop.permute.xlu0 %667 }
 0x182   : > { %676 = vst.msk [vmem:[#allocation3 + $0x19] sm:$0x7] %vm675_vm4, %v670_v30 }
 0x183   : > { %674 = vst.msk [vmem:[#allocation3 + $0x11] sm:$0x80] %vm673_vm5, %v668_v31  ;;  %387 = vrot.lane.b32.xlu1 %v1647_v54, %s1330_s18  ;;  %385 = vrot.lane.b32.xlu0 %v1511_v17, %s1330_s18 }
 0x185   : > { %v721_v33 = vpop.permute.xlu1 %720  ;;  %v719_v34 = vpop.permute.xlu0 %718 }
 0x186   : > { %725 = vst.msk [vmem:[#allocation3 + $0x1d] sm:$0x7] %vm675_vm4, %v721_v33  ;;  %vm527_vm4 = vcmask 917255  }
 0x187   : > { %724 = vst.msk [vmem:[#allocation3 + $0x15] sm:$0x80] %vm673_vm5, %v719_v34  ;;  %433 = vrot.lane.b32.xlu1 %v1647_v54, %s1329_s28  ;;  %431 = vrot.lane.b32.xlu0 %v1511_v17, %s1329_s28  ;;  %vm529_vm5 = vcmask 912128   ;;  %s890_s28 = sadd.s32 %s1284_s21, %s994_s9  ;;  %s1333_s21 = smov [#allocation7]  }
 0x188   : > { %s995_s18 = sshll.u32 %s890_s28, 7  ;;  %s1184_s26 = sshll.u32 %s1333_s21, 4  ;;  %s1185_s26 = int_to_ptr.vmem [resolvable:$false] %s1184_s26 }
 0x189   : > { %v396_v37 = vpop.permute.xlu1 %395  ;;  %v775_v38 = vpop.permute.xlu0 %774  ;;  %s892_s24 = scalar_lea.hbm %s1976_s4, %s995_s18  ;;  %s1186_s5 = scalar_lea.vmem %s1185_s26, 256 }
 0x18a   : > { %398 = vst.msk [vmem:[#allocation3 + $0x4] sm:$0xf] %vm321_vm12, %v396_v37  ;;  %vm348_vm12 = vcmask 522627   ;;  %p1187_p9 = scmp.lt.s32.totalorder %s895_s10, %s1185_s26  ;;  %p1188_p10 = scmp.lt.s32.totalorder %s1186_s5, %s1180_s7 }
 0x18b   : > { %777 = vst.msk [vmem:[#allocation3 + $0x1f] sm:$0x1e] %vm688_vm11, %v775_v38  ;;  %865 = vperm.xlu0 %1150, %v862_v35   ;;  %872 = vperm.xlu1 %1151, %v869_v36   ;;  %v778_v36 = vld [vmem:[%s1973_s1] sm:$0xff] }
 0x18c   : > { %p1189_p11 = por %p1188_p10, %p1187_p9 }
 0x18d   : > { %v492_v39 = vpop.permute.xlu1 %491  ;;  %v448_v17 = vpop.permute.xlu0 %447 }
 0x18e   : > { %495 = vst.msk [vmem:[#allocation3 + $0x9] sm:$0x78] %vm494_vm6, %v492_v39  ;;  %vm367_vm6 = vcmask 786053   ;;  %p1190_p13 = pnand %p1189_p11, %p1183_p8 }
 0x18f   : > { %450 = vst.msk [vmem:[#allocation3 + $0x6] sm:$0x3c] %vm339_vm13, %v448_v17 }
 0x191   : > { %v565_v40 = vpop.permute.xlu1 %564  ;;  %v563_v41 = vpop.permute.xlu0 %562 }
 0x192   : > { %v783_v42 = vld [vmem:[#allocation3 + $0x20] sm:$0xf]  ;;  %569 = vst.msk [vmem:[#allocation3 + $0x13] sm:$0x1] %vm509_vm14, %v565_v40 }
 0x193   : > { %568 = vst.msk [vmem:[#allocation3 + $0xb] sm:$0xe0] %vm507_vm15, %v563_v41  ;;  %1006 = vmatpush3.msk.msra.mxu0 %vm788_vm0, %v783_v42 }
 0x194   : > { %1007 = vmatprep.subr.mxu0 %v1324_v58 }
 0x195   : > { %v609_v43 = vpop.permute.xlu1 %608  ;;  %v607_v44 = vpop.permute.xlu0 %606 }
 0x196   : > { %613 = vst.msk [vmem:[#allocation3 + $0x17] sm:$0x1] %vm509_vm14, %v609_v43 }
 0x197   : > { %612 = vst.msk [vmem:[#allocation3 + $0xf] sm:$0xe0] %vm507_vm15, %v607_v44 }
 0x199   : > { %v727_v45 = vpop.permute.xlu1 %726  ;;  %v678_v46 = vpop.permute.xlu0 %677 }
 0x19a   : > { %729 = vst.msk [vmem:[#allocation3 + $0x1c] sm:$0xf] %vm680_vm7, %v727_v45  ;;  %681 = vst.msk [vmem:[#allocation3 + $0x18] sm:$0xf] %vm680_vm7, %v678_v46  ;;  %vm369_vm7 = vcmask 778880  }
 0x19d   : > { %v400_v47 = vpop.permute.xlu1 %399  ;;  %v328_v48 = vpop.permute.xlu0 %327 }
 0x19e   : > { %402 = vst.msk [vmem:[#allocation3 + $0x3] sm:$0x1e] %vm330_vm8, %v400_v47  ;;  %331 = vst.msk [vmem:[#allocation3 - $0x1] sm:$0x1e] %vm330_vm8, %v328_v48  ;;  %vm544_vm8 = vcmask 1044352  }
 0x1a1   : > { %v497_v49 = vpop.permute.xlu1 %496  ;;  %v452_v50 = vpop.permute.xlu0 %451 }
 0x1a2   : > { %500 = vst.msk [vmem:[#allocation3 + $0x8] sm:$0xf0] %vm499_vm9, %v497_v49  ;;  %vm379_vm9 = vcmask 917254  }
 0x1a3   : > { %454 = vst.msk [vmem:[#allocation3 + $0x5] sm:$0x78] %vm348_vm12, %v452_v50 }
 0x1a5   : > { %v573_v51 = vpop.permute.xlu1 %572  ;;  %v571_v52 = vpop.permute.xlu0 %570 }
 0x1a6   : > { %577 = vst.msk [vmem:[#allocation3 + $0x12] sm:$0x3] %vm519_vm1, %v573_v51 }
 0x1a7   : > { %576 = vst.msk [vmem:[#allocation3 + $0xa] sm:$0xc0] %vm517_vm2, %v571_v52 }
 0x1a9   : > { %v617_v53 = vpop.permute.xlu1 %616  ;;  %v615_v54 = vpop.permute.xlu0 %614 }
 0x1aa   : > { %621 = vst.msk [vmem:[#allocation3 + $0x16] sm:$0x3] %vm519_vm1, %v617_v53 }
 0x1ab   : > { %620 = vst.msk [vmem:[#allocation3 + $0xe] sm:$0xc0] %vm517_vm2, %v615_v54 }
 0x1ad   : > { %v731_v55 = vpop.permute.xlu1 %730  ;;  %v686_v56 = vpop.permute.xlu0 %685 }
 0x1ae   : > { %733 = vst.msk [vmem:[#allocation3 + $0x1b] sm:$0x1e] %vm688_vm11, %v731_v55  ;;  %689 = vst.msk [vmem:[#allocation3 + $0x17] sm:$0x1e] %vm688_vm11, %v686_v56  ;;  %vm391_vm11 = vcmask 1048455  }
 0x1b1   : > { %v404_v57 = vpop.permute.xlu1 %403  ;;  %v337_v59 = vpop.permute.xlu0 %336 }
 0x1b2   : > { %406 = vst.msk [vmem:[#allocation3 + $0x2] sm:$0x3c] %vm339_vm13, %v404_v57  ;;  %340 = vst.msk [vmem:[#allocation3 - $0x2] sm:$0x3c] %vm339_vm13, %v337_v59  ;;  %vm393_vm13 = vcmask 1043328  }
 0x1b5   : > { %v502_v60 = vpop.permute.xlu1 %501  ;;  %v456_v61 = vpop.permute.xlu0 %455  ;;  %v782_v62 = vld [vmem:[#allocation3 + $0x18] sm:$0xff] }
 0x1b6   : > { %508 = vst.msk [vmem:[#allocation3 + $0x7] sm:$0xe0] %vm507_vm15, %v502_v60  ;;  %1008 = vmatpush3.msra.mxu0 %v782_v62 }
 0x1b7   : > { %458 = vst.msk [vmem:[#allocation3 + $0x4] sm:$0xf0] %vm357_vm3, %v456_v61  ;;  %1009 = vmatprep.subr.mxu0 %v1324_v58 }
 0x1b9   : > { %v579_v63 = vpop.permute.xlu1 %578  ;;  %v504_v0 = vpop.permute.xlu0 %503 }
 0x1ba   : > { %584 = vst.msk [vmem:[#allocation3 + $0x9] sm:$0x80] %vm527_vm4, %v579_v63 }
 0x1bb   : > { %510 = vst.msk [vmem:[#allocation3 + $0xf] sm:$0x1] %vm509_vm14, %v504_v0  ;;  %vm784_vm14 = vcmask 293888  }
 0x1bd   : > { %v623_v1 = vpop.permute.xlu1 %622  ;;  %v581_v2 = vpop.permute.xlu0 %580 }
 0x1be   : > { %628 = vst.msk [vmem:[#allocation3 + $0xd] sm:$0x80] %vm527_vm4, %v623_v1 }
 0x1bf   : > { %585 = vst.msk [vmem:[#allocation3 + $0x11] sm:$0x7] %vm529_vm5, %v581_v2 }
 0x1c1   : > { %v346_v3 = vpop.permute.xlu1 %345  ;;  %v625_v4 = vpop.permute.xlu0 %624 }
 0x1c2   : > { %349 = vst.msk [vmem:[#allocation3 - $0x3] sm:$0x78] %vm348_vm12, %v346_v3 }
 0x1c3   : > { %629 = vst.msk [vmem:[#allocation3 + $0x15] sm:$0x7] %vm529_vm5, %v625_v4 }
 0x1c5   : > { %v460_v5 = vpop.permute.xlu1 %459  ;;  %v408_v6 = vpop.permute.xlu0 %407 }
 0x1c6   : > { %465 = vst.msk [vmem:[#allocation3 + $0x3] sm:$0xe0] %vm367_vm6, %v460_v5 }
 0x1c7   : > { %410 = vst.msk [vmem:[#allocation3 + $0x1] sm:$0x78] %vm348_vm12, %v408_v6 }
 0x1c9   : > { %v512_v7 = vpop.permute.xlu1 %511  ;;  %v462_v8 = vpop.permute.xlu0 %461 }
 0x1ca   : > { %518 = vst.msk [vmem:[#allocation3 + $0x6] sm:$0xc0] %vm517_vm2, %v512_v7 }
 0x1cb   : > { %466 = vst.msk [vmem:[#allocation3 + $0xb] sm:$0x1] %vm369_vm7, %v462_v8 }
 0x1cd   : > { %v587_v9 = vpop.permute.xlu1 %586  ;;  %v514_v10 = vpop.permute.xlu0 %513 }
 0x1ce   : > { %589 = vst.msk [vmem:[#allocation3 + $0x10] sm:$0xf] %vm544_vm8, %v587_v9 }
 0x1cf   : > { %520 = vst.msk [vmem:[#allocation3 + $0xe] sm:$0x3] %vm519_vm1, %v514_v10 }
 0x1d1   : > { %v355_v11 = vpop.permute.xlu1 %354  ;;  %v631_v12 = vpop.permute.xlu0 %630 }
 0x1d2   : > { %358 = vst.msk [vmem:[#allocation3 - $0x4] sm:$0xf0] %vm357_vm3, %v355_v11 }
 0x1d3   : > { %633 = vst.msk [vmem:[#allocation3 + $0x14] sm:$0xf] %vm544_vm8, %v631_v12 }
 0x1d5   : > { %v468_v13 = vpop.permute.xlu1 %467  ;;  %v412_v14 = vpop.permute.xlu0 %411 }
 0x1d6   : > { %473 = vst.msk [vmem:[#allocation3 + $0x2] sm:$0xc0] %vm379_vm9, %v468_v13 }
 0x1d7   : > { %414 = vst.msk [vmem:[#allocation3] sm:$0xf0] %vm357_vm3, %v412_v14 }
 0x1d9   : > { %v522_v15 = vpop.permute.xlu1 %521  ;;  %v470_v16 = vpop.permute.xlu0 %469 }
 0x1da   : > { %v781_v18 = vld [vmem:[#allocation3 + $0x10] sm:$0xff]  ;;  %528 = vst.msk [vmem:[#allocation3 + $0x5] sm:$0x80] %vm527_vm4, %v522_v15 }
 0x1db   : > { %474 = vst.msk [vmem:[#allocation3 + $0xa] sm:$0x3] %vm381_vm10, %v470_v16  ;;  %1010 = vmatpush3.msra.mxu0 %v781_v18 }
 0x1dc   : > { %1011 = vmatprep.subr.mxu0 %v1324_v58 }
 0x1dd   : > { %v362_v19 = vpop.permute.xlu1 %361  ;;  %v524_v20 = vpop.permute.xlu0 %523 }
 0x1de   : > { %368 = vst.msk [vmem:[#allocation3 - $0x5] sm:$0xe0] %vm367_vm6, %v362_v19 }
 0x1df   : > { %530 = vst.msk [vmem:[#allocation3 + $0xd] sm:$0x7] %vm529_vm5, %v524_v20 }
 0x1e1   : > { %v416_v21 = vpop.permute.xlu1 %415  ;;  %v364_v22 = vpop.permute.xlu0 %363 }
 0x1e2   : > { %421 = vst.msk [vmem:[#allocation3 - $0x1] sm:$0xe0] %vm367_vm6, %v416_v21 }
 0x1e3   : > { %370 = vst.msk [vmem:[#allocation3 + $0x3] sm:$0x1] %vm369_vm7, %v364_v22 }
 0x1e5   : > { %v476_v24 = vpop.permute.xlu1 %475  ;;  %v418_v25 = vpop.permute.xlu0 %417 }
 0x1e6   : > { %481 = vst.msk [vmem:[#allocation3 + $0x1] sm:$0x80] %vm391_vm11, %v476_v24 }
 0x1e7   : > { %422 = vst.msk [vmem:[#allocation3 + $0x7] sm:$0x1] %vm369_vm7, %v418_v25 }
 0x1e9   : > { %v542_v26 = vpop.permute.xlu1 %541  ;;  %v478_v27 = vpop.permute.xlu0 %477 }
 0x1ea   : > { %545 = vst.msk [vmem:[#allocation3 + $0xc] sm:$0xf] %vm544_vm8, %v542_v26 }
 0x1eb   : > { %482 = vst.msk [vmem:[#allocation3 + $0x9] sm:$0x7] %vm393_vm13, %v478_v27 }
 0x1ed   : > { %v376_v28 = vpop.permute.xlu1 %375  ;;  %v374_v23 = vpop.permute.xlu0 %373 }
 0x1ee   : > { %382 = vst.msk [vmem:[#allocation3 + $0x2] sm:$0x3] %vm381_vm10, %v376_v28 }
 0x1ef   : > { %380 = vst.msk [vmem:[#allocation3 - $0x6] sm:$0xc0] %vm379_vm9, %v374_v23 }
 0x1f1   : > { %v426_v29 = vpop.permute.xlu1 %425  ;;  %v424_v30 = vpop.permute.xlu0 %423 }
 0x1f2   : > { %v780_v31 = vld [vmem:[#allocation3 + $0x8] sm:$0xff]  ;;  %430 = vst.msk [vmem:[#allocation3 + $0x6] sm:$0x3] %vm381_vm10, %v426_v29 }
 0x1f3   : > { %429 = vst.msk [vmem:[#allocation3 - $0x2] sm:$0xc0] %vm379_vm9, %v424_v30  ;;  %1012 = vmatpush3.msra.mxu0 %v780_v31 }
 0x1f4   : > { %1013 = vmatprep.subr.mxu0 %v1324_v58 }
 0x1f5   : > { %v388_v32 = vpop.permute.xlu1 %387  ;;  %v386_v33 = vpop.permute.xlu0 %385 }
 0x1f6   : > { %394 = vst.msk [vmem:[#allocation3 + $0x1] sm:$0x7] %vm393_vm13, %v388_v32 }
 0x1f7   : > { %392 = vst.msk [vmem:[#allocation3 - $0x7] sm:$0x80] %vm391_vm11, %v386_v33 }
 0x1f9   : > { %v434_v34 = vpop.permute.xlu1 %433  ;;  %v432_v35 = vpop.permute.xlu0 %431 }
 0x1fa   : > { %438 = vst.msk [vmem:[#allocation3 + $0x5] sm:$0x7] %vm393_vm13, %v434_v34 }
 0x1fb   : > { %437 = vst.msk [vmem:[#allocation3 - $0x3] sm:$0x80] %vm391_vm11, %v432_v35 }
 0x202   : > { %v779_v58 = vld [vmem:[#allocation3] sm:$0xff] }
 0x203   : > { %1014 = vmatpush3.msra.mxu0 %v779_v58 }
 0x204   : > { %1016 = vmatmul.mubr.msk.f32.vlgmr.msra.gmra.mxu0 %vm784_vm14, %v778_v36 }
 0x206   : > { %v866_v37 = vpop.permute.xlu0 %865  ;;  %v873_v39 = vpop.permute.xlu1 %872 }
 0x2c4   : > { %v858_v38 = vpop.f32.mrf.mxu0 }
 0x2c5   : > { %v868_v17 = vmul.f32 %v866_v37, %v858_v38 }
 0x2c6   : > { %v1017_v40 = vpop.f32.mrf.mxu0 }
 0x2c7   : > { %v875_v41 = vadd.f32 %v873_v39, %v868_v17 }
 0x2c9   : > { %v876_v42 = vmax.f32 %v875_v41, 0.0 }
 0x2cb   : > { %877 = vst [vmem:[%s2008_s8] sm:$0xff] %v876_v42 }
 0x2cc   : > { %1193 = shalt.err (!%p1190_p13)
}
 0x2cd   : > { %s1194_s9 = scalar_lea.hbm %s892_s24, 128  ;;  %s1198_s18 = scalar_lea.hbm %s1976_s4, 512 }
 0x2ce   : > { %p1195_p0 = scmp.ne.s32.totalorder %s892_s24, %s1194_s9  ;;  %p1199_p6 = scmp.lt.s32.totalorder %s892_s24, %s1976_s4 }
 0x2cf   : > { %p1200_p4 = scmp.lt.s32.totalorder %s1198_s18, %s1194_s9 }
 0x2d0   : > { %p1196_p3 = pnand %p1195_p0, %p1441_p12 }
 0x2d1   : > { %p1201_p7 = por %p1200_p4, %p1199_p6 }
 0x2d2   : > { %p1197_p1 = pneg %p1196_p3 }
 0x2d4   : > { %p1202_p5 = pnand %p1201_p7, %p1197_p1 }
 0x2d6   : > { %1205 = shalt.err (!%p1202_p5)
}
 0x2d7   : > { %1020 = dma.vmem_to_hbm [thread:$0]  (%p1441_p12), %s895_s10, 128, %s892_s24, %s879_s27  }
 0x2d8 PF: > { %p1031_p8 = scmp.ge.s32.totalorder %s1300_s25, 2  ;;  %s906_s29 = sand.u32 1, %s1260_s15  }
 0x2d9   : > { %s907_s8 = scalar_lea.sflag [#allocation6], %s906_s29 }
 0x2da   : > { %p1027_p9 = pnand %p1031_p8, %p1454_p2 }
 0x2dc   : > { %p1028_p10 = pneg %p1027_p9 }
 0x2de   : > { %1255 = dma.done.wait (%p1028_p10), %s907_s8, 128  }
 0x2df   : > { %1257 = vsyncadd (%p1028_p10), %s907_s8, 4294967168  ;;  %s20_s25 = sadd.s32 1, %s1300_s25   ;;  %s2010_s21 = sld [smem:[#allocation10_spill]] }
 0x2e0   : > { %p17_p11 = scmp.ge.s32.totalorder %s20_s25, 6   ;;  %s2011_s22 = sld [smem:[#allocation11_spill]] }
 0x2e1   : > { %s2012_s23 = sld [smem:[#allocation12_spill]]  ;;  %s2014_s15 = smov %s1264_s16 }
 0x2e2   : > { %s2013_s24 = sld [smem:[#allocation13_spill]]  ;;  %s2015_s16 = smov %s1268_s17 }
 0x2e3   : > { %s2016_s17 = smov %s1449_s13  ;;  %s2017_s18 = smov %s1276_s19 }
 0x2e4   : > { %s2018_s19 = smov %s1280_s20  ;;  %s2019_s20 = smov %s1446_s12 }
 0x2e5   :  { %19 = sbr.rel (!%p17_p11) target bundleno = 9 (0x9), region = 86 }
 0x2ea   :  { %912 = vsyncpa [#allocation5], 1 }
 0x2eb   :  { %914 = vsyncpa [#allocation5 + $0x1], 1 }
 0x2ec   :  { %915 = vsyncpa [#allocation6], 1 }
 0x2ed   :  { %917 = vsyncpa [#allocation6 + $0x1], 1 }

</bundles_post_ra>
